<compile_context>
chip_gen: v7x
topology: tpu7x:2x2x1
jax: 0.10.0
libtpu: 0.0.40
codegen_flags: <defaults>
</compile_context>

<pallas_src>
import jax
import jax.numpy as jnp
from jax.experimental import pallas as pl
from jax.experimental.pallas import tpu as pltpu

# ---- small model dims consistent with ClipModel.forward ----
B = 2                      # batch
SEQ = 8                    # token sequence length
PREFIX_LEN = 4             # prefix_length (<=10 -> MLP clip_project path)
PREFIX_SIZE = 64           # CLIP prefix feature dim
E = 32                     # gpt_embedding_size
V = 128                    # vocab size
NH = 4                     # attention heads
HD = E // NH               # head dim
T = PREFIX_LEN + SEQ       # total sequence after concatenation (12)
H1 = E * PREFIX_LEN // 2   # clip_project MLP hidden (64)
H2 = E * PREFIX_LEN        # clip_project MLP output (128)
MAX_POS = 32               # positional-embedding table size
LANES = 128

# ---- row layout of the packed f32 "vector" slab (biases, LN params, wpe) ----
ROW_CB1, ROW_CB2 = 0, 1
ROW_LN1G, ROW_LN1B = 2, 3
ROW_BQKV, ROW_BAO = 4, 5
ROW_LN2G, ROW_LN2B = 6, 7
ROW_BFC, ROW_BMO = 8, 9
ROW_LNFG, ROW_LNFB = 10, 11
ROW_WPE = 12
VEC_ROWS = ROW_WPE + T     # 24 (multiple of 8)


# ------------------------------------------------------------------
# Single fused kernel, one grid step per batch element:
# clip_project + embed + concat + wpe + GPT block + final LN + tied LM head
# ------------------------------------------------------------------
def _clip_gpt_kernel(tok_ref, prefix_ref, vec_ref, wclip_ref, wattn_ref,
                     whead_ref, wtall_ref, out_ref):
    f32, bf16 = jnp.float32, jnp.bfloat16

    def vrow(r, n):                               # (1, n) f32 row of the packed slab
        return vec_ref[r:r + 1, 0:n]

    def layernorm(x, g, b):
        mu = jnp.mean(x, axis=-1, keepdims=True)
        var = jnp.mean(jnp.square(x - mu), axis=-1, keepdims=True)
        return (x - mu) * jax.lax.rsqrt(var + 1e-5) * g + b

    # ---- clip_project MLP: Linear -> Tanh -> Linear (this batch element) ----
    h1 = jnp.tanh(jnp.dot(prefix_ref[...].astype(bf16),
                          wclip_ref[0:PREFIX_SIZE, 0:H1],
                          preferred_element_type=f32) + vrow(ROW_CB1, H1))        # (1, H1)
    proj = jnp.dot(h1.astype(bf16),
                   wclip_ref[PREFIX_SIZE:PREFIX_SIZE + H1, 0:H2],
                   preferred_element_type=f32) + vrow(ROW_CB2, H2)                # (1, L*E)

    # ---- token embedding via bf16 one-hot matmul (no gather) ----
    tok = tok_ref[...]                                                            # (SEQ, 1) i32
    onehot = (jax.lax.broadcasted_iota(jnp.int32, (SEQ, V), 1) == tok).astype(bf16)
    emb_text = jnp.dot(onehot, wtall_ref[0:V, :], preferred_element_type=f32)     # (SEQ, E)

    # ---- embedding_cat = [prefix_proj ; text_emb] in registers + positional ----
    x = jnp.concatenate(
        [proj[:, l * E:(l + 1) * E] for l in range(PREFIX_LEN)] + [emb_text],
        axis=0) + vec_ref[ROW_WPE:ROW_WPE + T, 0:E]                               # (T, E) f32

    # ---- GPT-2 block: LN -> causal MHA -> residual -> LN -> GELU MLP -> residual ----
    hln = layernorm(x, vrow(ROW_LN1G, E), vrow(ROW_LN1B, E))
    qkv = jnp.dot(hln.astype(bf16), wattn_ref[:, 0:3 * E],
                  preferred_element_type=f32) + vrow(ROW_BQKV, 3 * E)             # (T, 3E)
    q = qkv[:, 0:E] * (1.0 / (HD ** 0.5))
    k = qkv[:, E:2 * E]
    v = qkv[:, 2 * E:3 * E]

    # causal additive bias built in-kernel (scores stay f32, so -1e30 is safe)
    rowi = jax.lax.broadcasted_iota(jnp.int32, (T, T), 0)
    coli = jax.lax.broadcasted_iota(jnp.int32, (T, T), 1)
    causal_bias = jnp.where(coli <= rowi, 0.0, -1e30).astype(f32)                 # (T, T)

    # all-head scores stacked along sublanes -> ONE batched softmax pass
    scores = jnp.concatenate(
        [jnp.einsum('qd,kd->qk', q[:, h * HD:(h + 1) * HD], k[:, h * HD:(h + 1) * HD],
                    preferred_element_type=f32) + causal_bias
         for h in range(NH)], axis=0)                                             # (NH*T, T)
    scores = scores - jnp.max(scores, axis=-1, keepdims=True)
    p = jnp.exp(scores)
    p = p * pl.reciprocal(jnp.sum(p, axis=-1, keepdims=True), approx=True)

    attn = jnp.concatenate(
        [jnp.dot(p[h * T:(h + 1) * T, :], v[:, h * HD:(h + 1) * HD],
                 preferred_element_type=f32) for h in range(NH)], axis=-1)        # (T, E)
    x = x + jnp.dot(attn.astype(bf16), wattn_ref[:, 3 * E:4 * E],
                    preferred_element_type=f32) + vrow(ROW_BAO, E)

    h2 = layernorm(x, vrow(ROW_LN2G, E), vrow(ROW_LN2B, E))
    m = jax.nn.gelu(jnp.dot(h2.astype(bf16), whead_ref[0:E, :],
                            preferred_element_type=f32) + vrow(ROW_BFC, 4 * E),
                    approximate=True)                                             # GPT-2 gelu_new
    x = x + jnp.dot(m.astype(bf16), wtall_ref[V:V + 4 * E, :],
                    preferred_element_type=f32) + vrow(ROW_BMO, E)

    # ---- final LN + tied LM head (pre-transposed wte -> lane-dense (T, V)) ----
    xf = layernorm(x, vrow(ROW_LNFG, E), vrow(ROW_LNFB, E))
    out_ref[...] = jnp.dot(xf.astype(bf16), whead_ref[E:2 * E, :],
                           preferred_element_type=f32)                            # (T, V)


# ------------------------------------------------------------------
# One-time parameter packing (hoisted out of the per-call path)
# ------------------------------------------------------------------
def pack_params(p):
    f32, bf16 = jnp.float32, jnp.bfloat16
    vec = jnp.zeros((VEC_ROWS, LANES), f32)

    def put(v, row, arr):
        arr = jnp.asarray(arr, f32).reshape(-1)
        return v.at[row, :arr.shape[0]].set(arr)

    vec = put(vec, ROW_CB1, p['c_b1'])
    vec = put(vec, ROW_CB2, p['c_b2'])
    vec = put(vec, ROW_LN1G, p['ln1_g'])
    vec = put(vec, ROW_LN1B, p['ln1_b'])
    vec = put(vec, ROW_BQKV, jnp.concatenate([p['b_q'], p['b_k'], p['b_v']], axis=-1))
    vec = put(vec, ROW_BAO, p['b_ao'])
    vec = put(vec, ROW_LN2G, p['ln2_g'])
    vec = put(vec, ROW_LN2B, p['ln2_b'])
    vec = put(vec, ROW_BFC, p['b_fc'])
    vec = put(vec, ROW_BMO, p['b_mo'])
    vec = put(vec, ROW_LNFG, p['lnf_g'])
    vec = put(vec, ROW_LNFB, p['lnf_b'])
    vec = vec.at[ROW_WPE:ROW_WPE + T, :E].set(p['wpe'][:T].astype(f32))

    w_clip = jnp.zeros((PREFIX_SIZE + H1, LANES), bf16)                 # (128, 128)
    w_clip = w_clip.at[0:PREFIX_SIZE, 0:H1].set(p['c_w1'].astype(bf16))
    w_clip = w_clip.at[PREFIX_SIZE:PREFIX_SIZE + H1, 0:H2].set(p['c_w2'].astype(bf16))

    w_attn = jnp.concatenate([p['w_q'], p['w_k'], p['w_v'], p['w_ao']],
                             axis=1).astype(bf16)                       # (E, 4E)
    w_head = jnp.concatenate([p['w_fc'], p['wte'].T], axis=0).astype(bf16)   # (2E, 128)
    w_tall = jnp.concatenate([p['wte'], p['w_mo']], axis=0).astype(bf16)     # (V+4E, E)

    return {'vec': vec, 'w_clip': w_clip, 'w_attn': w_attn,
            'w_head': w_head, 'w_tall': w_tall}


# ------------------------------------------------------------------
# ClipModel.forward (labels=None, mask=None) -> logits (B, T, V)
# ------------------------------------------------------------------
def clip_model_forward(tokens, prefix, packed):
    tok3d = tokens.reshape(B, SEQ, 1).astype(jnp.int32)
    pre3d = prefix.reshape(B, 1, PREFIX_SIZE).astype(jnp.float32)
    ins = (tok3d, pre3d, packed['vec'], packed['w_clip'], packed['w_attn'],
           packed['w_head'], packed['w_tall'])

    def shared(shape):
        return pl.BlockSpec(shape, lambda b: (0, 0))

    in_specs = [
        pl.BlockSpec((None, SEQ, 1), lambda b: (b, 0, 0)),              # tokens (per batch)
        pl.BlockSpec((None, 1, PREFIX_SIZE), lambda b: (b, 0, 0)),      # prefix (per batch)
        shared((VEC_ROWS, LANES)),                                      # biases/LN/wpe slab
        shared((PREFIX_SIZE + H1, LANES)),                              # clip MLP weights
        shared((E, 4 * E)),                                             # [wq|wk|wv|wao]
        shared((2 * E, LANES)),                                         # [w_fc ; wte^T]
        shared((V + 4 * E, E)),                                         # [wte ; w_mo]
    ]
    out_specs = pl.BlockSpec((None, T, V), lambda b: (b, 0, 0))

    flops = 2 * B * (PREFIX_SIZE * H1 + H1 * H2        # clip_project MLP
                     + SEQ * V * E                     # one-hot embedding
                     + T * E * 3 * E + T * E * E       # qkv + attn-out proj
                     + 2 * NH * T * T * HD             # scores + p@v
                     + 2 * T * E * 4 * E               # GELU MLP
                     + T * E * V)                      # tied LM head
    transcendentals = B * (H1 + NH * T * T + T * 4 * E + NH * T + 3 * T)
    bytes_accessed = sum(int(a.size) * a.dtype.itemsize for a in ins) + B * T * V * 4
    cost = pl.CostEstimate(flops=flops, transcendentals=transcendentals,
                           bytes_accessed=bytes_accessed)

    logits = pl.pallas_call(
        _clip_gpt_kernel,
        out_shape=jax.ShapeDtypeStruct((B, T, V), jnp.float32),
        grid=(B,),
        in_specs=in_specs,
        out_specs=out_specs,
        compiler_params=pltpu.CompilerParams(dimension_semantics=("parallel",)),
        cost_estimate=cost,
    )(*ins)
    # TODO(synk): labels path (shifted xent over [dummy_token; tokens]) not
    # exercised (labels=None); at real GPT-2 sizes (E=768, V=50257) the tied LM
    # head must be vocab-tiled (bf16 weight alone exceeds v7x's 64 MiB VMEM)
    # instead of shipping wte and wte^T whole as done at these toy dims.
    return logits


def init_params(key):
    std = 0.02
    ks = jax.random.split(key, 10)
    n = lambda k, shape: (std * jax.random.normal(k, shape)).astype(jnp.float32)
    zeros = lambda shape: jnp.zeros(shape, jnp.float32)
    ones = lambda shape: jnp.ones(shape, jnp.float32)
    return {
        # clip_project MLP: (PREFIX_SIZE -> H1) Tanh (H1 -> H2)
        'c_w1': n(ks[0], (PREFIX_SIZE, H1)), 'c_b1': zeros((1, H1)),
        'c_w2': n(ks[1], (H1, H2)),          'c_b2': zeros((1, H2)),
        # GPT-2-style single block (tied LM head via wte)
        'wte': n(ks[2], (V, E)),
        'wpe': n(ks[3], (MAX_POS, E)),
        'ln1_g': ones((1, E)), 'ln1_b': zeros((1, E)),
        'w_q': n(ks[4], (E, E)), 'b_q': zeros((1, E)),
        'w_k': n(ks[5], (E, E)), 'b_k': zeros((1, E)),
        'w_v': n(ks[6], (E, E)), 'b_v': zeros((1, E)),
        'w_ao': n(ks[7], (E, E)), 'b_ao': zeros((1, E)),
        'ln2_g': ones((1, E)), 'ln2_b': zeros((1, E)),
        'w_fc': n(ks[8], (E, 4 * E)), 'b_fc': zeros((1, 4 * E)),
        'w_mo': n(ks[9], (4 * E, E)), 'b_mo': zeros((1, E)),
        'lnf_g': ones((1, E)), 'lnf_b': zeros((1, E)),
    }


if __name__ == "__main__":
    key = jax.random.PRNGKey(0)
    k_par, k_tok, k_pre = jax.random.split(key, 3)
    params = init_params(k_par)
    packed = pack_params(params)          # one-time packing / casting (hoisted)

    tokens = jax.random.randint(k_tok, (B, SEQ), 0, V, dtype=jnp.int32)
    prefix = jax.random.normal(k_pre, (B, PREFIX_SIZE), dtype=jnp.float32)

    fwd = jax.jit(clip_model_forward)
    logits = jax.block_until_ready(fwd(tokens, prefix, packed))

    assert logits.shape == (B, T, V), logits.shape
    assert bool(jnp.all(jnp.isfinite(logits)))
    print("KERNEL_OK")
</pallas_src>

<mosaic_0001>
module attributes {stable_mosaic.version = 11 : i64} {
  func.func @_clip_gpt_kernel(%arg0: i32, %arg1: memref<1x8x1xi32, #tpu.memory_space<vmem>>, %arg2: memref<1x1x64xf32, #tpu.memory_space<vmem>>, %arg3: memref<24x128xf32, #tpu.memory_space<vmem>>, %arg4: memref<128x128xbf16, #tpu.memory_space<vmem>>, %arg5: memref<32x128xbf16, #tpu.memory_space<vmem>>, %arg6: memref<64x128xbf16, #tpu.memory_space<vmem>>, %arg7: memref<256x32xbf16, #tpu.memory_space<vmem>>, %arg8: memref<1x12x128xf32, #tpu.memory_space<vmem>>) attributes {dimension_semantics = [#tpu.dimension_semantics<parallel>], iteration_bounds = array<i64: 2>, scalar_prefetch = 0 : i64, scratch_operands = 0 : i64, tpu.core_type = #tpu.core_type<tc>, window_params = [{transform_indices = @transform_0, window_bounds = array<i64: 1, 8, 1>}, {transform_indices = @transform_1, window_bounds = array<i64: 1, 1, 64>}, {pipeline_mode = #tpu.pipeline_mode<synchronous>, transform_indices = @transform_2, window_bounds = array<i64: 24, 128>}, {pipeline_mode = #tpu.pipeline_mode<synchronous>, transform_indices = @transform_3, window_bounds = array<i64: 128, 128>}, {pipeline_mode = #tpu.pipeline_mode<synchronous>, transform_indices = @transform_4, window_bounds = array<i64: 32, 128>}, {pipeline_mode = #tpu.pipeline_mode<synchronous>, transform_indices = @transform_5, window_bounds = array<i64: 64, 128>}, {pipeline_mode = #tpu.pipeline_mode<synchronous>, transform_indices = @transform_6, window_bounds = array<i64: 256, 32>}, {transform_indices = @transform_7, window_bounds = array<i64: 1, 12, 128>}]} {
    %c0 = arith.constant 0 : index
    %c0_0 = arith.constant 0 : index
    %c0_1 = arith.constant 0 : index
    %0 = vector.load %arg2[%c0, %c0_0, %c0_1] : memref<1x1x64xf32, #tpu.memory_space<vmem>>, vector<1x1x64xf32>
    %1 = vector.shape_cast %0 : vector<1x1x64xf32> to vector<1x64xf32>
    %2 = arith.truncf %1 : vector<1x64xf32> to vector<1x64xbf16>
    %c0_2 = arith.constant 0 : index
    %c0_3 = arith.constant 0 : index
    %3 = vector.load %arg4[%c0_2, %c0_3] : memref<128x128xbf16, #tpu.memory_space<vmem>>, vector<64x64xbf16>
    %cst = arith.constant dense<0.000000e+00> : vector<1x64xf32>
    %4 = tpu.matmul %2, %3, %cst {dimension_numbers = #tpu.dot_dimension_numbers<[1], [0], [0], [1], [0, 0, 1, 1], [], []>} : vector<1x64xbf16>, vector<64x64xbf16>, vector<1x64xf32> -> vector<1x64xf32>
    %c0_4 = arith.constant 0 : index
    %c0_5 = arith.constant 0 : index
    %5 = vector.load %arg3[%c0_4, %c0_5] : memref<24x128xf32, #tpu.memory_space<vmem>>, vector<1x64xf32>
    %6 = arith.addf %4, %5 : vector<1x64xf32>
    %7 = math.tanh %6 : vector<1x64xf32>
    %8 = arith.truncf %7 : vector<1x64xf32> to vector<1x64xbf16>
    %c64 = arith.constant 64 : index
    %c0_6 = arith.constant 0 : index
    %9 = vector.load %arg4[%c64, %c0_6] : memref<128x128xbf16, #tpu.memory_space<vmem>>, vector<64x128xbf16>
    %cst_7 = arith.constant dense<0.000000e+00> : vector<1x128xf32>
    %10 = tpu.matmul %8, %9, %cst_7 {dimension_numbers = #tpu.dot_dimension_numbers<[1], [0], [0], [1], [0, 0, 1, 1], [], []>} : vector<1x64xbf16>, vector<64x128xbf16>, vector<1x128xf32> -> vector<1x128xf32>
    %c1 = arith.constant 1 : index
    %c0_8 = arith.constant 0 : index
    %11 = vector.load %arg3[%c1, %c0_8] : memref<24x128xf32, #tpu.memory_space<vmem>>, vector<1x128xf32>
    %12 = arith.addf %10, %11 : vector<1x128xf32>
    %c0_9 = arith.constant 0 : index
    %c0_10 = arith.constant 0 : index
    %c0_11 = arith.constant 0 : index
    %13 = vector.load %arg1[%c0_9, %c0_10, %c0_11] : memref<1x8x1xi32, #tpu.memory_space<vmem>>, vector<1x8x1xi32>
    %14 = vector.shape_cast %13 : vector<1x8x1xi32> to vector<8x1xi32>
    %15 = tpu.iota {dimensions = array<i32: 1>} : vector<8x128xi32>
    %16 = vector.broadcast %14 : vector<8x1xi32> to vector<8x128xi32>
    %17 = arith.cmpi eq, %15, %16 : vector<8x128xi32>
    %18 = arith.extui %17 : vector<8x128xi1> to vector<8x128xi32>
    %19 = arith.sitofp %18 : vector<8x128xi32> to vector<8x128xf32>
    %20 = arith.truncf %19 : vector<8x128xf32> to vector<8x128xbf16>
    %c0_12 = arith.constant 0 : index
    %c0_13 = arith.constant 0 : index
    %21 = vector.load %arg7[%c0_12, %c0_13] : memref<256x32xbf16, #tpu.memory_space<vmem>>, vector<128x32xbf16>
    %cst_14 = arith.constant dense<0.000000e+00> : vector<8x32xf32>
    %22 = tpu.matmul %20, %21, %cst_14 {dimension_numbers = #tpu.dot_dimension_numbers<[1], [0], [0], [1], [0, 0, 1, 1], [], []>} : vector<8x128xbf16>, vector<128x32xbf16>, vector<8x32xf32> -> vector<8x32xf32>
    %23 = vector.extract_strided_slice %12 {offsets = [0, 0], sizes = [1, 32], strides = [1, 1]} : vector<1x128xf32> to vector<1x32xf32>
    %24 = vector.extract_strided_slice %12 {offsets = [0, 32], sizes = [1, 32], strides = [1, 1]} : vector<1x128xf32> to vector<1x32xf32>
    %25 = vector.extract_strided_slice %12 {offsets = [0, 64], sizes = [1, 32], strides = [1, 1]} : vector<1x128xf32> to vector<1x32xf32>
    %26 = vector.extract_strided_slice %12 {offsets = [0, 96], sizes = [1, 32], strides = [1, 1]} : vector<1x128xf32> to vector<1x32xf32>
    %27 = tpu.concatenate %23, %24, %25, %26, %22 in 0 : vector<1x32xf32>, vector<1x32xf32>, vector<1x32xf32>, vector<1x32xf32>, vector<8x32xf32> -> vector<12x32xf32>
    %c12 = arith.constant 12 : index
    %c0_15 = arith.constant 0 : index
    %28 = vector.load %arg3[%c12, %c0_15] : memref<24x128xf32, #tpu.memory_space<vmem>>, vector<12x32xf32>
    %29 = arith.addf %27, %28 : vector<12x32xf32>
    %c2 = arith.constant 2 : index
    %c0_16 = arith.constant 0 : index
    %30 = vector.load %arg3[%c2, %c0_16] : memref<24x128xf32, #tpu.memory_space<vmem>>, vector<1x32xf32>
    %c3 = arith.constant 3 : index
    %c0_17 = arith.constant 0 : index
    %31 = vector.load %arg3[%c3, %c0_17] : memref<24x128xf32, #tpu.memory_space<vmem>>, vector<1x32xf32>
    %cst_18 = arith.constant dense<0.000000e+00> : vector<12xf32>
    %32 = vector.multi_reduction <add>, %29, %cst_18 [1] : vector<12x32xf32> to vector<12xf32>
    %33 = vector.shape_cast %32 : vector<12xf32> to vector<12x1xf32>
    %cst_19 = arith.constant 3.200000e+01 : f32
    %34 = vector.broadcast %cst_19 : f32 to vector<12x1xf32>
    %35 = arith.divf %33, %34 : vector<12x1xf32>
    %36 = vector.broadcast %35 : vector<12x1xf32> to vector<12x32xf32>
    %37 = arith.subf %29, %36 : vector<12x32xf32>
    %38 = arith.mulf %37, %37 : vector<12x32xf32>
    %cst_20 = arith.constant dense<0.000000e+00> : vector<12xf32>
    %39 = vector.multi_reduction <add>, %38, %cst_20 [1] : vector<12x32xf32> to vector<12xf32>
    %40 = vector.shape_cast %39 : vector<12xf32> to vector<12x1xf32>
    %cst_21 = arith.constant 3.200000e+01 : f32
    %41 = vector.broadcast %cst_21 : f32 to vector<12x1xf32>
    %42 = arith.divf %40, %41 : vector<12x1xf32>
    %43 = vector.broadcast %35 : vector<12x1xf32> to vector<12x32xf32>
    %44 = arith.subf %29, %43 : vector<12x32xf32>
    %cst_22 = arith.constant 9.99999974E-6 : f32
    %45 = vector.broadcast %cst_22 : f32 to vector<12x1xf32>
    %46 = arith.addf %42, %45 : vector<12x1xf32>
    %47 = math.rsqrt %46 : vector<12x1xf32>
    %48 = vector.broadcast %47 : vector<12x1xf32> to vector<12x32xf32>
    %49 = arith.mulf %44, %48 : vector<12x32xf32>
    %50 = vector.broadcast %30 : vector<1x32xf32> to vector<12x32xf32>
    %51 = arith.mulf %49, %50 : vector<12x32xf32>
    %52 = vector.broadcast %31 : vector<1x32xf32> to vector<12x32xf32>
    %53 = arith.addf %51, %52 : vector<12x32xf32>
    %54 = arith.truncf %53 : vector<12x32xf32> to vector<12x32xbf16>
    %c0_23 = arith.constant 0 : index
    %c0_24 = arith.constant 0 : index
    %55 = vector.load %arg5[%c0_23, %c0_24] : memref<32x128xbf16, #tpu.memory_space<vmem>>, vector<32x96xbf16>
    %cst_25 = arith.constant dense<0.000000e+00> : vector<12x96xf32>
    %56 = tpu.matmul %54, %55, %cst_25 {dimension_numbers = #tpu.dot_dimension_numbers<[1], [0], [0], [1], [0, 0, 1, 1], [], []>} : vector<12x32xbf16>, vector<32x96xbf16>, vector<12x96xf32> -> vector<12x96xf32>
    %c4 = arith.constant 4 : index
    %c0_26 = arith.constant 0 : index
    %57 = vector.load %arg3[%c4, %c0_26] : memref<24x128xf32, #tpu.memory_space<vmem>>, vector<1x96xf32>
    %58 = vector.broadcast %57 : vector<1x96xf32> to vector<12x96xf32>
    %59 = arith.addf %56, %58 : vector<12x96xf32>
    %60 = vector.extract_strided_slice %59 {offsets = [0, 0], sizes = [12, 32], strides = [1, 1]} : vector<12x96xf32> to vector<12x32xf32>
    %cst_27 = arith.constant 0.353553385 : f32
    %61 = vector.broadcast %cst_27 : f32 to vector<12x32xf32>
    %62 = arith.mulf %60, %61 : vector<12x32xf32>
    %63 = vector.extract_strided_slice %59 {offsets = [0, 32], sizes = [12, 32], strides = [1, 1]} : vector<12x96xf32> to vector<12x32xf32>
    %64 = vector.extract_strided_slice %59 {offsets = [0, 64], sizes = [12, 32], strides = [1, 1]} : vector<12x96xf32> to vector<12x32xf32>
    %65 = tpu.iota {dimensions = array<i32: 0>} : vector<12x12xi32>
    %66 = tpu.iota {dimensions = array<i32: 1>} : vector<12x12xi32>
    %67 = arith.cmpi sle, %66, %65 : vector<12x12xi32>
    %cst_28 = arith.constant 0.000000e+00 : f32
    %cst_29 = arith.constant -1.000000e+30 : f32
    %68 = vector.broadcast %cst_28 : f32 to vector<12x12xf32>
    %69 = vector.broadcast %cst_29 : f32 to vector<12x12xf32>
    %70 = arith.select %67, %68, %69 : vector<12x12xi1>, vector<12x12xf32>
    %71 = vector.extract_strided_slice %62 {offsets = [0, 0], sizes = [12, 8], strides = [1, 1]} : vector<12x32xf32> to vector<12x8xf32>
    %72 = vector.extract_strided_slice %63 {offsets = [0, 0], sizes = [12, 8], strides = [1, 1]} : vector<12x32xf32> to vector<12x8xf32>
    "tpu.trace_start"() <{level = 10 : i32, message = "qd,kd->qk"}> : () -> ()
    %cst_30 = arith.constant dense<0.000000e+00> : vector<12x12xf32>
    %73 = tpu.matmul %71, %72, %cst_30 {dimension_numbers = #tpu.dot_dimension_numbers<[1], [1], [0], [0], [0, 0, 1, 0], [], []>} : vector<12x8xf32>, vector<12x8xf32>, vector<12x12xf32> -> vector<12x12xf32>
    "tpu.trace_stop"() : () -> ()
    %74 = arith.addf %73, %70 : vector<12x12xf32>
    %75 = vector.extract_strided_slice %62 {offsets = [0, 8], sizes = [12, 8], strides = [1, 1]} : vector<12x32xf32> to vector<12x8xf32>
    %76 = vector.extract_strided_slice %63 {offsets = [0, 8], sizes = [12, 8], strides = [1, 1]} : vector<12x32xf32> to vector<12x8xf32>
    "tpu.trace_start"() <{level = 10 : i32, message = "qd,kd->qk"}> : () -> ()
    %cst_31 = arith.constant dense<0.000000e+00> : vector<12x12xf32>
    %77 = tpu.matmul %75, %76, %cst_31 {dimension_numbers = #tpu.dot_dimension_numbers<[1], [1], [0], [0], [0, 0, 1, 0], [], []>} : vector<12x8xf32>, vector<12x8xf32>, vector<12x12xf32> -> vector<12x12xf32>
    "tpu.trace_stop"() : () -> ()
    %78 = arith.addf %77, %70 : vector<12x12xf32>
    %79 = vector.extract_strided_slice %62 {offsets = [0, 16], sizes = [12, 8], strides = [1, 1]} : vector<12x32xf32> to vector<12x8xf32>
    %80 = vector.extract_strided_slice %63 {offsets = [0, 16], sizes = [12, 8], strides = [1, 1]} : vector<12x32xf32> to vector<12x8xf32>
    "tpu.trace_start"() <{level = 10 : i32, message = "qd,kd->qk"}> : () -> ()
    %cst_32 = arith.constant dense<0.000000e+00> : vector<12x12xf32>
    %81 = tpu.matmul %79, %80, %cst_32 {dimension_numbers = #tpu.dot_dimension_numbers<[1], [1], [0], [0], [0, 0, 1, 0], [], []>} : vector<12x8xf32>, vector<12x8xf32>, vector<12x12xf32> -> vector<12x12xf32>
    "tpu.trace_stop"() : () -> ()
    %82 = arith.addf %81, %70 : vector<12x12xf32>
    %83 = vector.extract_strided_slice %62 {offsets = [0, 24], sizes = [12, 8], strides = [1, 1]} : vector<12x32xf32> to vector<12x8xf32>
    %84 = vector.extract_strided_slice %63 {offsets = [0, 24], sizes = [12, 8], strides = [1, 1]} : vector<12x32xf32> to vector<12x8xf32>
    "tpu.trace_start"() <{level = 10 : i32, message = "qd,kd->qk"}> : () -> ()
    %cst_33 = arith.constant dense<0.000000e+00> : vector<12x12xf32>
    %85 = tpu.matmul %83, %84, %cst_33 {dimension_numbers = #tpu.dot_dimension_numbers<[1], [1], [0], [0], [0, 0, 1, 0], [], []>} : vector<12x8xf32>, vector<12x8xf32>, vector<12x12xf32> -> vector<12x12xf32>
    "tpu.trace_stop"() : () -> ()
    %86 = arith.addf %85, %70 : vector<12x12xf32>
    %87 = tpu.concatenate %74, %78, %82, %86 in 0 : vector<12x12xf32>, vector<12x12xf32>, vector<12x12xf32>, vector<12x12xf32> -> vector<48x12xf32>
    %cst_34 = arith.constant dense<0xFF800000> : vector<48xf32>
    %88 = vector.multi_reduction <maximumf>, %87, %cst_34 [1] : vector<48x12xf32> to vector<48xf32>
    %89 = vector.shape_cast %88 : vector<48xf32> to vector<48x1xf32>
    %90 = vector.broadcast %89 : vector<48x1xf32> to vector<48x12xf32>
    %91 = arith.subf %87, %90 : vector<48x12xf32>
    %92 = math.exp %91 : vector<48x12xf32>
    %cst_35 = arith.constant dense<0.000000e+00> : vector<48xf32>
    %93 = vector.multi_reduction <add>, %92, %cst_35 [1] : vector<48x12xf32> to vector<48xf32>
    %94 = vector.shape_cast %93 : vector<48xf32> to vector<48x1xf32>
    %95 = tpu.reciprocal %94 {approx = true} : vector<48x1xf32> -> vector<48x1xf32>
    %96 = vector.broadcast %95 : vector<48x1xf32> to vector<48x12xf32>
    %97 = arith.mulf %92, %96 : vector<48x12xf32>
    %98 = vector.extract_strided_slice %97 {offsets = [0, 0], sizes = [12, 12], strides = [1, 1]} : vector<48x12xf32> to vector<12x12xf32>
    %99 = vector.extract_strided_slice %64 {offsets = [0, 0], sizes = [12, 8], strides = [1, 1]} : vector<12x32xf32> to vector<12x8xf32>
    %cst_36 = arith.constant dense<0.000000e+00> : vector<12x8xf32>
    %100 = tpu.matmul %98, %99, %cst_36 {dimension_numbers = #tpu.dot_dimension_numbers<[1], [0], [0], [1], [0, 0, 1, 1], [], []>} : vector<12x12xf32>, vector<12x8xf32>, vector<12x8xf32> -> vector<12x8xf32>
    %101 = vector.extract_strided_slice %97 {offsets = [12, 0], sizes = [12, 12], strides = [1, 1]} : vector<48x12xf32> to vector<12x12xf32>
    %102 = vector.extract_strided_slice %64 {offsets = [0, 8], sizes = [12, 8], strides = [1, 1]} : vector<12x32xf32> to vector<12x8xf32>
    %cst_37 = arith.constant dense<0.000000e+00> : vector<12x8xf32>
    %103 = tpu.matmul %101, %102, %cst_37 {dimension_numbers = #tpu.dot_dimension_numbers<[1], [0], [0], [1], [0, 0, 1, 1], [], []>} : vector<12x12xf32>, vector<12x8xf32>, vector<12x8xf32> -> vector<12x8xf32>
    %104 = vector.extract_strided_slice %97 {offsets = [24, 0], sizes = [12, 12], strides = [1, 1]} : vector<48x12xf32> to vector<12x12xf32>
    %105 = vector.extract_strided_slice %64 {offsets = [0, 16], sizes = [12, 8], strides = [1, 1]} : vector<12x32xf32> to vector<12x8xf32>
    %cst_38 = arith.constant dense<0.000000e+00> : vector<12x8xf32>
    %106 = tpu.matmul %104, %105, %cst_38 {dimension_numbers = #tpu.dot_dimension_numbers<[1], [0], [0], [1], [0, 0, 1, 1], [], []>} : vector<12x12xf32>, vector<12x8xf32>, vector<12x8xf32> -> vector<12x8xf32>
    %107 = vector.extract_strided_slice %97 {offsets = [36, 0], sizes = [12, 12], strides = [1, 1]} : vector<48x12xf32> to vector<12x12xf32>
    %108 = vector.extract_strided_slice %64 {offsets = [0, 24], sizes = [12, 8], strides = [1, 1]} : vector<12x32xf32> to vector<12x8xf32>
    %cst_39 = arith.constant dense<0.000000e+00> : vector<12x8xf32>
    %109 = tpu.matmul %107, %108, %cst_39 {dimension_numbers = #tpu.dot_dimension_numbers<[1], [0], [0], [1], [0, 0, 1, 1], [], []>} : vector<12x12xf32>, vector<12x8xf32>, vector<12x8xf32> -> vector<12x8xf32>
    %110 = tpu.concatenate %100, %103, %106, %109 in 1 : vector<12x8xf32>, vector<12x8xf32>, vector<12x8xf32>, vector<12x8xf32> -> vector<12x32xf32>
    %111 = arith.truncf %110 : vector<12x32xf32> to vector<12x32xbf16>
    %c0_40 = arith.constant 0 : index
    %c96 = arith.constant 96 : index
    %112 = vector.load %arg5[%c0_40, %c96] : memref<32x128xbf16, #tpu.memory_space<vmem>>, vector<32x32xbf16>
    %cst_41 = arith.constant dense<0.000000e+00> : vector<12x32xf32>
    %113 = tpu.matmul %111, %112, %cst_41 {dimension_numbers = #tpu.dot_dimension_numbers<[1], [0], [0], [1], [0, 0, 1, 1], [], []>} : vector<12x32xbf16>, vector<32x32xbf16>, vector<12x32xf32> -> vector<12x32xf32>
    %114 = arith.addf %29, %113 : vector<12x32xf32>
    %c5 = arith.constant 5 : index
    %c0_42 = arith.constant 0 : index
    %115 = vector.load %arg3[%c5, %c0_42] : memref<24x128xf32, #tpu.memory_space<vmem>>, vector<1x32xf32>
    %116 = vector.broadcast %115 : vector<1x32xf32> to vector<12x32xf32>
    %117 = arith.addf %114, %116 : vector<12x32xf32>
    %c6 = arith.constant 6 : index
    %c0_43 = arith.constant 0 : index
    %118 = vector.load %arg3[%c6, %c0_43] : memref<24x128xf32, #tpu.memory_space<vmem>>, vector<1x32xf32>
    %c7 = arith.constant 7 : index
    %c0_44 = arith.constant 0 : index
    %119 = vector.load %arg3[%c7, %c0_44] : memref<24x128xf32, #tpu.memory_space<vmem>>, vector<1x32xf32>
    %cst_45 = arith.constant dense<0.000000e+00> : vector<12xf32>
    %120 = vector.multi_reduction <add>, %117, %cst_45 [1] : vector<12x32xf32> to vector<12xf32>
    %121 = vector.shape_cast %120 : vector<12xf32> to vector<12x1xf32>
    %cst_46 = arith.constant 3.200000e+01 : f32
    %122 = vector.broadcast %cst_46 : f32 to vector<12x1xf32>
    %123 = arith.divf %121, %122 : vector<12x1xf32>
    %124 = vector.broadcast %123 : vector<12x1xf32> to vector<12x32xf32>
    %125 = arith.subf %117, %124 : vector<12x32xf32>
    %126 = arith.mulf %125, %125 : vector<12x32xf32>
    %cst_47 = arith.constant dense<0.000000e+00> : vector<12xf32>
    %127 = vector.multi_reduction <add>, %126, %cst_47 [1] : vector<12x32xf32> to vector<12xf32>
    %128 = vector.shape_cast %127 : vector<12xf32> to vector<12x1xf32>
    %cst_48 = arith.constant 3.200000e+01 : f32
    %129 = vector.broadcast %cst_48 : f32 to vector<12x1xf32>
    %130 = arith.divf %128, %129 : vector<12x1xf32>
    %131 = vector.broadcast %123 : vector<12x1xf32> to vector<12x32xf32>
    %132 = arith.subf %117, %131 : vector<12x32xf32>
    %cst_49 = arith.constant 9.99999974E-6 : f32
    %133 = vector.broadcast %cst_49 : f32 to vector<12x1xf32>
    %134 = arith.addf %130, %133 : vector<12x1xf32>
    %135 = math.rsqrt %134 : vector<12x1xf32>
    %136 = vector.broadcast %135 : vector<12x1xf32> to vector<12x32xf32>
    %137 = arith.mulf %132, %136 : vector<12x32xf32>
    %138 = vector.broadcast %118 : vector<1x32xf32> to vector<12x32xf32>
    %139 = arith.mulf %137, %138 : vector<12x32xf32>
    %140 = vector.broadcast %119 : vector<1x32xf32> to vector<12x32xf32>
    %141 = arith.addf %139, %140 : vector<12x32xf32>
    %142 = arith.truncf %141 : vector<12x32xf32> to vector<12x32xbf16>
    %c0_50 = arith.constant 0 : index
    %c0_51 = arith.constant 0 : index
    %143 = vector.load %arg6[%c0_50, %c0_51] : memref<64x128xbf16, #tpu.memory_space<vmem>>, vector<32x128xbf16>
    %cst_52 = arith.constant dense<0.000000e+00> : vector<12x128xf32>
    %144 = tpu.matmul %142, %143, %cst_52 {dimension_numbers = #tpu.dot_dimension_numbers<[1], [0], [0], [1], [0, 0, 1, 1], [], []>} : vector<12x32xbf16>, vector<32x128xbf16>, vector<12x128xf32> -> vector<12x128xf32>
    %c8 = arith.constant 8 : index
    %c0_53 = arith.constant 0 : index
    %145 = vector.load %arg3[%c8, %c0_53] : memref<24x128xf32, #tpu.memory_space<vmem>>, vector<1x128xf32>
    %146 = vector.broadcast %145 : vector<1x128xf32> to vector<12x128xf32>
    %147 = arith.addf %144, %146 : vector<12x128xf32>
    %148 = arith.mulf %147, %147 : vector<12x128xf32>
    %149 = arith.mulf %147, %148 : vector<12x128xf32>
    %cst_54 = arith.constant 4.471500e-02 : f32
    %150 = vector.broadcast %cst_54 : f32 to vector<12x128xf32>
    %151 = arith.mulf %150, %149 : vector<12x128xf32>
    %152 = arith.addf %147, %151 : vector<12x128xf32>
    %cst_55 = arith.constant 0.797884583 : f32
    %153 = vector.broadcast %cst_55 : f32 to vector<12x128xf32>
    %154 = arith.mulf %153, %152 : vector<12x128xf32>
    %155 = math.tanh %154 : vector<12x128xf32>
    %cst_56 = arith.constant 1.000000e+00 : f32
    %156 = vector.broadcast %cst_56 : f32 to vector<12x128xf32>
    %157 = arith.addf %156, %155 : vector<12x128xf32>
    %cst_57 = arith.constant 5.000000e-01 : f32
    %158 = vector.broadcast %cst_57 : f32 to vector<12x128xf32>
    %159 = arith.mulf %158, %157 : vector<12x128xf32>
    %160 = arith.mulf %147, %159 : vector<12x128xf32>
    %161 = arith.truncf %160 : vector<12x128xf32> to vector<12x128xbf16>
    %c128 = arith.constant 128 : index
    %c0_58 = arith.constant 0 : index
    %162 = vector.load %arg7[%c128, %c0_58] : memref<256x32xbf16, #tpu.memory_space<vmem>>, vector<128x32xbf16>
    %cst_59 = arith.constant dense<0.000000e+00> : vector<12x32xf32>
    %163 = tpu.matmul %161, %162, %cst_59 {dimension_numbers = #tpu.dot_dimension_numbers<[1], [0], [0], [1], [0, 0, 1, 1], [], []>} : vector<12x128xbf16>, vector<128x32xbf16>, vector<12x32xf32> -> vector<12x32xf32>
    %164 = arith.addf %117, %163 : vector<12x32xf32>
    %c9 = arith.constant 9 : index
    %c0_60 = arith.constant 0 : index
    %165 = vector.load %arg3[%c9, %c0_60] : memref<24x128xf32, #tpu.memory_space<vmem>>, vector<1x32xf32>
    %166 = vector.broadcast %165 : vector<1x32xf32> to vector<12x32xf32>
    %167 = arith.addf %164, %166 : vector<12x32xf32>
    %c10 = arith.constant 10 : index
    %c0_61 = arith.constant 0 : index
    %168 = vector.load %arg3[%c10, %c0_61] : memref<24x128xf32, #tpu.memory_space<vmem>>, vector<1x32xf32>
    %c11 = arith.constant 11 : index
    %c0_62 = arith.constant 0 : index
    %169 = vector.load %arg3[%c11, %c0_62] : memref<24x128xf32, #tpu.memory_space<vmem>>, vector<1x32xf32>
    %cst_63 = arith.constant dense<0.000000e+00> : vector<12xf32>
    %170 = vector.multi_reduction <add>, %167, %cst_63 [1] : vector<12x32xf32> to vector<12xf32>
    %171 = vector.shape_cast %170 : vector<12xf32> to vector<12x1xf32>
    %cst_64 = arith.constant 3.200000e+01 : f32
    %172 = vector.broadcast %cst_64 : f32 to vector<12x1xf32>
    %173 = arith.divf %171, %172 : vector<12x1xf32>
    %174 = vector.broadcast %173 : vector<12x1xf32> to vector<12x32xf32>
    %175 = arith.subf %167, %174 : vector<12x32xf32>
    %176 = arith.mulf %175, %175 : vector<12x32xf32>
    %cst_65 = arith.constant dense<0.000000e+00> : vector<12xf32>
    %177 = vector.multi_reduction <add>, %176, %cst_65 [1] : vector<12x32xf32> to vector<12xf32>
    %178 = vector.shape_cast %177 : vector<12xf32> to vector<12x1xf32>
    %cst_66 = arith.constant 3.200000e+01 : f32
    %179 = vector.broadcast %cst_66 : f32 to vector<12x1xf32>
    %180 = arith.divf %178, %179 : vector<12x1xf32>
    %181 = vector.broadcast %173 : vector<12x1xf32> to vector<12x32xf32>
    %182 = arith.subf %167, %181 : vector<12x32xf32>
    %cst_67 = arith.constant 9.99999974E-6 : f32
    %183 = vector.broadcast %cst_67 : f32 to vector<12x1xf32>
    %184 = arith.addf %180, %183 : vector<12x1xf32>
    %185 = math.rsqrt %184 : vector<12x1xf32>
    %186 = vector.broadcast %185 : vector<12x1xf32> to vector<12x32xf32>
    %187 = arith.mulf %182, %186 : vector<12x32xf32>
    %188 = vector.broadcast %168 : vector<1x32xf32> to vector<12x32xf32>
    %189 = arith.mulf %187, %188 : vector<12x32xf32>
    %190 = vector.broadcast %169 : vector<1x32xf32> to vector<12x32xf32>
    %191 = arith.addf %189, %190 : vector<12x32xf32>
    %192 = arith.truncf %191 : vector<12x32xf32> to vector<12x32xbf16>
    %c32 = arith.constant 32 : index
    %c0_68 = arith.constant 0 : index
    %193 = vector.load %arg6[%c32, %c0_68] : memref<64x128xbf16, #tpu.memory_space<vmem>>, vector<32x128xbf16>
    %cst_69 = arith.constant dense<0.000000e+00> : vector<12x128xf32>
    %194 = tpu.matmul %192, %193, %cst_69 {dimension_numbers = #tpu.dot_dimension_numbers<[1], [0], [0], [1], [0, 0, 1, 1], [], []>} : vector<12x32xbf16>, vector<32x128xbf16>, vector<12x128xf32> -> vector<12x128xf32>
    %c0_70 = arith.constant 0 : index
    %c0_71 = arith.constant 0 : index
    %c0_72 = arith.constant 0 : index
    %195 = vector.load %arg8[%c0_70, %c0_71, %c0_72] : memref<1x12x128xf32, #tpu.memory_space<vmem>>, vector<1x12x128xf32>
    %196 = vector.shape_cast %195 : vector<1x12x128xf32> to vector<12x128xf32>
    %197 = vector.shape_cast %194 : vector<12x128xf32> to vector<1x12x128xf32>
    tpu.vector_store %arg8[%c0_70, %c0_71, %c0_72], %197 {strides = array<i32>} : memref<1x12x128xf32, #tpu.memory_space<vmem>>, vector<1x12x128xf32>,
    return
  }
  func.func @transform_0(%arg0: i32) -> (i32, i32, i32) {
    %c0_i32 = arith.constant 0 : i32
    %c0_i32_0 = arith.constant 0 : i32
    %c0_i32_1 = arith.constant 0 : i32
    return %arg0, %c0_i32, %c0_i32_0 : i32, i32, i32
  }
  func.func @transform_1(%arg0: i32) -> (i32, i32, i32) {
    %c0_i32 = arith.constant 0 : i32
    %c0_i32_0 = arith.constant 0 : i32
    %c0_i32_1 = arith.constant 0 : i32
    return %arg0, %c0_i32, %c0_i32_0 : i32, i32, i32
  }
  func.func @transform_2(%arg0: i32) -> (i32, i32) {
    %c0_i32 = arith.constant 0 : i32
    %c0_i32_0 = arith.constant 0 : i32
    %c0_i32_1 = arith.constant 0 : i32
    return %c0_i32, %c0_i32_0 : i32, i32
  }
  func.func @transform_3(%arg0: i32) -> (i32, i32) {
    %c0_i32 = arith.constant 0 : i32
    %c0_i32_0 = arith.constant 0 : i32
    %c0_i32_1 = arith.constant 0 : i32
    return %c0_i32, %c0_i32_0 : i32, i32
  }
  func.func @transform_4(%arg0: i32) -> (i32, i32) {
    %c0_i32 = arith.constant 0 : i32
    %c0_i32_0 = arith.constant 0 : i32
    %c0_i32_1 = arith.constant 0 : i32
    return %c0_i32, %c0_i32_0 : i32, i32
  }
  func.func @transform_5(%arg0: i32) -> (i32, i32) {
    %c0_i32 = arith.constant 0 : i32
    %c0_i32_0 = arith.constant 0 : i32
    %c0_i32_1 = arith.constant 0 : i32
    return %c0_i32, %c0_i32_0 : i32, i32
  }
  func.func @transform_6(%arg0: i32) -> (i32, i32) {
    %c0_i32 = arith.constant 0 : i32
    %c0_i32_0 = arith.constant 0 : i32
    %c0_i32_1 = arith.constant 0 : i32
    return %c0_i32, %c0_i32_0 : i32, i32
  }
  func.func @transform_7(%arg0: i32) -> (i32, i32, i32) {
    %c0_i32 = arith.constant 0 : i32
    %c0_i32_0 = arith.constant 0 : i32
    %c0_i32_1 = arith.constant 0 : i32
    return %arg0, %c0_i32, %c0_i32_0 : i32, i32, i32
  }
}

</mosaic_0001>

<bundles_post_ra>
// kernel: clip_model_forward.1
= control target key start
LH: loop header
LB: loop body
LE: loop exit
PB: predicated region body
PF: predicated region fallthrough
CT: control target
= control target key end

     0   :  { %s2614_s24 = smov 0   ;;  %s2967_s0 = inlined_call_operand.vmem [shape: s32[2,8,1], index: 0, kind: input, shape index: {}]   ;;  %s2968_s1 = inlined_call_operand.vmem [shape: f32[2,1,64], index: 1, kind: input, shape index: {}]   ;;  %s2969_s2 = inlined_call_operand.vmem [shape: f32[24,128], index: 2, kind: input, shape index: {}]   ;;  %s2970_s3 = inlined_call_operand.vmem [shape: bf16[128,128], index: 3, kind: input, shape index: {}]   ;;  %s2971_s4 = inlined_call_operand.vmem [shape: bf16[32,128], index: 4, kind: input, shape index: {}]   ;;  %s2972_s5 = inlined_call_operand.vmem [shape: bf16[64,128], index: 5, kind: input, shape index: {}]   ;;  %s2973_s6 = inlined_call_operand.vmem [shape: bf16[256,32], index: 6, kind: input, shape index: {}]   ;;  %s2974_s7 = inlined_call_operand.vmem [shape: f32[2,12,128], index: 7, kind: output, shape index: {}]  }
   0x1 LB: > { %s2024_s25 = sadd.s32 4294967295, %s2551_s24   ;;  %p2028_p0 = scmp.ge.s32.totalorder %s2551_s24, 1  ;;  %s2551_s24 = sphi %s2614_s24, %s17_s24  }
   0x2   : > { %p244_p1 = scmp.lt.s32.totalorder %s2551_s24, 3 }
   0x4   : > { %p245_p2 = pnand %p2028_p0, %p244_p1 }
   0x5   : > { %v2471_v0 = vld [vmem:[%s2970_s3] sm:$0xff] (!%p245_p2)   ;;  %v2553_v1 = vmov (!%p245_p2), 0.0   ;;  %v2472_v2 = vld [vmem:[%s2970_s3 + $0x8] sm:$0xff] (!%p245_p2)   ;;  %vm2554_vm0 = vmmov (!%p245_p2), 0   ;;  %p278_p3 = scmp.lt.s32.totalorder (!%p245_p2), %s2024_s25, 1  ;;  %v2555_v3 = vmov (!%p245_p2), 0   ;;  %v449_v19 = vlaneseq (!%p245_p2) }
   0x6   : > { %248 = sbr.rel (%p245_p2) target bundleno = 3669 (0xe55), region = 48  ;;  %2186 = vmatprep.subr.bf16.mxu1 (!%p245_p2), %v2553_v1  ;;  %2210 = vmatprep.subr.bf16.mxu0 (!%p245_p2), %v2553_v1  ;;  %v2473_v4 = vld [vmem:[%s2970_s3 + $0x10] sm:$0xff] (!%p245_p2)   ;;  %v2474_v5 = vld [vmem:[%s2970_s3 + $0x18] sm:$0xff] (!%p245_p2)   ;;  %vm326_vm1 = vcmask (!%p245_p2), 523264   ;;  %v2475_v9 = vld [vmem:[%s2970_s3 + $0x20] sm:$0xff] (!%p245_p2)   ;;  %s2557_s27 = smov (!%p245_p2), 64  }
   0x7   : > { %2187 = vmatpush3.bf16.msra.mxu1 (!%p245_p2), %v2471_v0  ;;  %2194 = vmatprep.mubr.msk.bf16.mxu1 (!%p245_p2), %vm2554_vm0, %v2553_v1  ;;  %v2476_v10 = vld [vmem:[%s2970_s3 + $0x28] sm:$0xff] (!%p245_p2)   ;;  %v2477_v11 = vld [vmem:[%s2970_s3 + $0x30] sm:$0xff] (!%p245_p2)   ;;  %v2478_v12 = vld [vmem:[%s2970_s3 + $0x38] sm:$0xff] (!%p245_p2)   ;;  %v2701_v21 = vand.u32 (!%p245_p2), 127, %v449_v19  ;;  %v2556_v24 = vmov (!%p245_p2), 1.0|1.0  }
   0x8   : > { %2188 = vmatprep.subr.bf16.mxu1 (!%p245_p2), %v2553_v1  ;;  %2226 = vmatprep.mubr.msk.bf16.mxu0 (!%p245_p2), %vm2554_vm0, %v2553_v1  ;;  %v2479_v13 = vld [vmem:[%s2973_s6] sm:$0xff] (!%p245_p2)   ;;  %v2480_v14 = vld [vmem:[%s2973_s6 + $0x8] sm:$0xff] (!%p245_p2)   ;;  %v2481_v15 = vld [vmem:[%s2973_s6 + $0x10] sm:$0xff] (!%p245_p2)   ;;  %s2558_s28 = smov (!%p245_p2), 96   ;;  %s2559_s29 = smov (!%p245_p2), 32   ;;  %vm596_vm4 = vcmask (!%p245_p2), 257024  }
   0x9   : > { %2415 = vset.pattern.permute.xlu0 (!%p245_p2), %v2555_v3  ;;  %2211 = vmatpush3.bf16.msra.mxu0 (!%p245_p2), %v2479_v13  ;;  %v2482_v16 = vld [vmem:[%s2973_s6 + $0x18] sm:$0xff] (!%p245_p2)   ;;  %v2483_v17 = vld [vmem:[%s2973_s6 + $0x20] sm:$0xff] (!%p245_p2)   ;;  %v2484_v18 = vld [vmem:[%s2973_s6 + $0x28] sm:$0xff] (!%p245_p2)   ;;  %vm578_vm5 = vcmask (!%p245_p2), 1040384   ;;  %vm580_vm6 = vcmask (!%p245_p2), 1041408   ;;  %vm582_vm7 = vcmask (!%p245_p2), 1042432  }
   0xa   : > { %2212 = vmatprep.subr.bf16.mxu0 (!%p245_p2), %v2553_v1  ;;  %v2485_v20 = vld [vmem:[%s2973_s6 + $0x30] sm:$0xff] (!%p245_p2)   ;;  %v2486_v23 = vld [vmem:[%s2973_s6 + $0x38] sm:$0xff] (!%p245_p2)   ;;  %v301_v25 = vld [vmem:[%s2969_s2] sm:$0x1] (!%p245_p2)  ;;  %vm584_vm8 = vcmask (!%p245_p2), 1043456   ;;  %vm592_vm9 = vcmask (!%p245_p2), 261120  }
   0xb   : > { %2189 = vmatpush3.bf16.msra.mxu1 (!%p245_p2), %v2472_v2  ;;  %v380_v37 = vld [vmem:[%s2969_s2 + $0x1] sm:$0x1] (!%p245_p2)  ;;  %v587_v47 = vld [vmem:[%s2969_s2 + $0x14] sm:$0xf] (!%p245_p2)  ;;  %v586_v55 = vld [vmem:[%s2969_s2 + $0xc] sm:$0xff] (!%p245_p2)  ;;  %vm714_vm10 = vcmask (!%p245_p2), 64512  }
   0xc   : > { %2190 = vmatprep.subr.bf16.mxu1 (!%p245_p2), %v2553_v1  ;;  %s2560_s21 = smov (!%p245_p2), 88   ;;  %s2561_s22 = smov (!%p245_p2), 120   ;;  %vm2766_vm11 = vmpackc.low (!%p245_p2), %vm714_vm10, %vm714_vm10  ;;  %vm1089_vm14 = vcmask (!%p245_p2), 97280   ;;  %vm2567_vm15 = vmmov (!%p245_p2), 1  }
   0xd   : > { %s2980_s25 = smov (!%p278_p3, %s2024_s25), 1  ;;  %2213 = vmatpush3.bf16.msra.mxu0 %v2480_v14  ;;  %s2562_s23 = smov 72  }
   0xe   : > { %s284_s11 = scalar_lea.vmem %s2968_s1, %s2980_s25  ;;  %s2029_s12 = sshll.u32 %s2980_s25, 3  ;;  %2214 = vmatprep.subr.bf16.mxu0 %v2553_v1 }
   0xf   : > { %s281_s15 = scalar_lea.vmem %s2967_s0, %s2029_s12  ;;  %v291_v6 = vld [vmem:[%s284_s11] sm:$0x1]  ;;  %2191 = vmatpush3.bf16.msra.mxu1 %v2473_v4  ;;  %s2563_s26 = smov 104  }
  0x10   : > { %v448_v7 = vld [vmem:[%s281_s15] sm:$0xff]  ;;  %2192 = vmatprep.subr.bf16.mxu1 %v2553_v1  ;;  %v292_v8 = vpack.c.bf16 %v291_v6, %v291_v6  ;;  %s2564_s30 = smov 80   ;;  %s2565_s8 = smov 112  }
  0x11   : > { %452 = vperm.xlu0 %2415, %v448_v7   ;;  %2215 = vmatpush3.bf16.msra.mxu0 %v2481_v15  ;;  %v2487_v7 = vld [vmem:[%s2971_s4] sm:$0xff]   ;;  %s2570_s9 = smov 56   ;;  %s2571_s12 = smov 16  }
  0x12   : > { %2216 = vmatprep.subr.bf16.mxu0 %v2553_v1  ;;  %s2572_s13 = smov 8   ;;  %s2573_s16 = smov 24  }
  0x13   : > { %2193 = vmatpush3.bf16.msra.mxu1 %v2474_v5 }
  0x14   : > { %2198 = vmatprep.subr.bf16.mxu1 %v2553_v1 }
  0x15   : > { %2217 = vmatpush3.bf16.msra.mxu0 %v2482_v16 }
  0x16   : > { %2195 = vmatmul.mubr.msk.bf16.vlgmr.msra.gmra.mrb[0].mxu1 %vm326_vm1, %v292_v8  ;;  %2218 = vmatprep.subr.bf16.mxu0 %v2553_v1  ;;  %v2488_v8 = vld [vmem:[%s2971_s4 + $0x8] sm:$0xff]  }
  0x17   : > { %2206 = vmatprep.mubr.msk.bf16.mxu1 %vm2554_vm0, %v2553_v1  ;;  %2199 = vmatpush3.bf16.msra.mxu1 %v2475_v9 }
  0x18   : > { %2200 = vmatprep.subr.bf16.mxu1 %v2553_v1 }
  0x19   : > { %2219 = vmatpush3.bf16.msra.mxu0 %v2483_v17  ;;  %v2053_v17 = vld [vmem:[%s2969_s2 + $0x2] ss:$0 sm:$0xff] }
  0x1a   : > { %2220 = vmatprep.subr.bf16.mxu0 %v2553_v1 }
  0x1b   : > { %2201 = vmatpush3.bf16.msra.mxu1 %v2476_v10 }
  0x1c   : > { %2202 = vmatprep.subr.bf16.mxu1 %v2553_v1 }
  0x1d   : > { %2221 = vmatpush3.bf16.msra.mxu0 %v2484_v18 }
  0x1e   : > { %2222 = vmatprep.subr.bf16.mxu0 %v2553_v1 }
  0x1f   : > { %2203 = vmatpush3.bf16.msra.mxu1 %v2477_v11 }
  0x20   : > { %2204 = vmatprep.subr.bf16.mxu1 %v2553_v1 }
  0x21   : > { %2223 = vmatpush3.bf16.msra.mxu0 %v2485_v20 }
  0x22   : > { %2224 = vmatprep.subr.bf16.mxu0 %v2553_v1 }
  0x23   : > { %2205 = vmatpush3.bf16.msra.mxu1 %v2478_v12 }
  0x24   : > { %2230 = vmatprep.subr.bf16.mxu1 %v2553_v1 }
  0x25   : > { %2225 = vmatpush3.bf16.msra.mxu0 %v2486_v23  ;;  %v2054_v23 = vld [vmem:[%s2969_s2 + $0x3] ss:$0 sm:$0xff] }
  0x90   : > { %v453_v22 = vpop.permute.xlu0 %452 }
  0x91   : > { %vm454_vm2 = vcmp.eq.s32.totalorder %v2701_v21, %v453_v22 }
  0x92   : > { %vm2051_vm3 = vmpackc.low %vm454_vm2, %vm454_vm2  ;;  %vm1538_vm2 = vcmask 130048  }
  0x93   : > { %2227 = vmatmul.mubr.msk.bf16.vlgmr.msra.gmra.mrb[0].mxu0 %vm2051_vm3, %v2556_v24  ;;  %vm1541_vm3 = vcmask 195584  }
  0xe9   : > { %v364_v26 = vpop.f32.mrb[0].mxu1 }
  0xea   : > { %v365_v27 = vadd.f32 %v364_v26, %v301_v25  ;;  %v2196_v28 = vpop.f32.mrb[1].mxu1 }
  0xeb   : > { %v367_v29 = vpop.f32.mrb[2].mxu1  ;;  %v2055_v28 = vld [vmem:[%s2969_s2 + $0x4] ss:$0 sm:$0xff] }
  0xec   : > { %2503 = vtanh.f32 %v365_v27  ;;  %v2197_v30 = vpop.f32.mrb[3].mxu1 }
  0xf6   : > { %v2504_v31 = vpop.eup %2503 }
  0xf7   : > { %v371_v32 = vpack.c.bf16 %v2504_v31, %v2504_v31 }
  0xf9   : > { %2207 = vmatmul.mubr.msk.bf16.vlgmr.msra.gmra.mrb[4].mxu1 %vm326_vm1, %v371_v32  ;;  %vm2810_vm1 = vmpackc.low %vm584_vm8, %vm2567_vm15 }
  0xfa   : > { %2234 = vmatprep.mubr.msk.bf16.mxu1 %vm2554_vm0, %v2553_v1  ;;  %2231 = vmatpush3.bf16.msra.mxu1 %v2487_v7 }
  0xfb   : > { %2232 = vmatprep.subr.bf16.mxu1 %v2553_v1 }
  0xfe   : > { %2233 = vmatpush3.bf16.msra.mxu1 %v2488_v8 }
 0x166   : > { %v556_v33 = vpop.f32.mrb[0].mxu0 }
 0x167   : > { %v2228_v34 = vpop.f32.mrb[1].mxu0  ;;  %v576_v46 = vrot.slane %v556_v33, 4 }
 0x168   : > { %v559_v35 = vpop.f32.mrb[2].mxu0 }
 0x169   : > { %v2229_v36 = vpop.f32.mrb[3].mxu0  ;;  %v2723_v48 = vadd.f32 %v587_v47, %v576_v46 }
 0x16b   : > { %v597_v49 = vsel %vm596_vm4, %v2723_v48, 0.0 }
 0x1cc   : > { %v442_v38 = vpop.f32.mrb[4].mxu1 }
 0x1cd   : > { %v443_v39 = vadd.f32 %v442_v38, %v380_v37  ;;  %v2208_v40 = vpop.f32.mrb[5].mxu1 }
 0x1ce   : > { %v445_v41 = vpop.f32.mrb[6].mxu1 }
 0x1cf   : > { %v2209_v42 = vpop.f32.mrb[7].mxu1  ;;  %v567_v43 = vrot.slane %v443_v39, 6  ;;  %v563_v44 = vrot.slane %v443_v39, 7  ;;  %v571_v45 = vrot.slane %v443_v39, 5 }
 0x1d1   : > { %568 = vrot.lane.b32.xlu1 %v567_v43, %s2557_s27  ;;  %564 = vrot.lane.b32.xlu0 %v563_v44, %s2558_s28 }
 0x1d5   : > { %572 = vrot.lane.b32.xlu1 %v571_v45, %s2559_s29 }
 0x1f9   : > { %598 = vadd.xlane.f32.xlu1 %v597_v49 }
 0x243   : > { %v569_v50 = vpop.permute.xlu1 %568  ;;  %v565_v51 = vpop.permute.xlu0 %564 }
 0x244   : > { %v579_v52 = vsel %vm578_vm5, %v443_v39, %v565_v51 }
 0x245   : > { %v581_v54 = vsel %vm580_vm6, %v579_v52, %v569_v50 }
 0x247   : > { %v573_v53 = vpop.permute.xlu1 %572 }
 0x248   : > { %v583_v56 = vsel %vm582_vm7, %v581_v54, %v573_v53 }
 0x249   : > { %v585_v57 = vsel %vm584_vm8, %v583_v56, %v576_v46 }
 0x24a   : > { %v2731_v58 = vadd.f32 %v586_v55, %v585_v57 }
 0x24c   : > { %v593_v59 = vsel %vm592_vm9, %v2731_v58, 0.0 }
 0x24d   : > { %594 = vadd.xlane.f32.xlu0 %v593_v59 }
 0x286   : > { %v599_v60 = vpop.xlane.xlu1 %598 }
 0x287   : > { %v602_v61 = vmul.f32 0.03125, %v599_v60 }
 0x289   : > { %v604_v0 = vsub.f32 %v2723_v48, %v602_v61 }
 0x28b   : > { %v606_v5 = vmul.f32 %v604_v0, %v604_v0 }
 0x28d   : > { %v610_v6 = vsel %vm596_vm4, %v606_v5, 0.0 }
 0x2da   : > { %v595_v62 = vpop.xlane.xlu0 %594 }
 0x2db   : > { %v601_v63 = vmul.f32 0.03125, %v595_v62 }
 0x2dd   : > { %v603_v2 = vsub.f32 %v2731_v58, %v601_v63  ;;  %v702_v63 = vshrl.u32 %v449_v19, 7 }
 0x2df   : > { %v605_v3 = vmul.f32 %v603_v2, %v603_v2  ;;  %vm704_vm13 = vcmp.le.s32.totalorder %v2701_v21, %v702_v63 }
 0x2e1   : > { %v607_v4 = vsel %vm592_vm9, %v605_v3, 0.0 }
 0x2e2   : > { %608 = vadd.xlane.f32.xlu0 %v607_v4 }
 0x2e6   : > { %611 = vadd.xlane.f32.xlu0 %v610_v6 }
 0x36f   : > { %v609_v9 = vpop.xlane.xlu0 %608 }
 0x370   : > { %v613_v10 = vmul.f32 0.03125, %v609_v9 }
 0x372   : > { %v615_v11 = vadd.f32 1e-05, %v613_v10 }
 0x373   : > { %v612_v12 = vpop.xlane.xlu0 %611 }
 0x374   : > { %2505 = vrsqrt.f32 %v615_v11  ;;  %v614_v13 = vmul.f32 0.03125, %v612_v12 }
 0x376   : > { %v616_v14 = vadd.f32 1e-05, %v614_v13 }
 0x378   : > { %2507 = vrsqrt.f32 %v616_v14 }
 0x37e   : > { %v2506_v15 = vpop.eup %2505 }
 0x37f   : > { %v619_v16 = vmul.f32 %v2506_v15, %v603_v2  ;;  %v2566_v2 = vmov -1e+30  }
 0x380   : > { %v706_v4 = vsel %vm704_vm13, 0.0, %v2566_v2 }
 0x381   : > { %v625_v20 = vmul.f32 %v2053_v17, %v619_v16 }
 0x382   : > { %v2508_v18 = vpop.eup %2507 }
 0x383   : > { %v620_v22 = vmul.f32 %v2508_v18, %v604_v0  ;;  %v631_v25 = vadd.f32 %v2054_v23, %v625_v20  ;;  %v703_v0 = vadd.s32 8, %v702_v63 }
 0x385   : > { %v626_v24 = vmul.f32 %v2053_v17, %v620_v22  ;;  %vm705_vm12 = vcmp.le.s32.totalorder %v2701_v21, %v703_v0 }
 0x386   : > { %v707_v3 = vsel %vm705_vm12, 0.0, %v2566_v2 }
 0x387   : > { %v632_v26 = vadd.f32 %v2054_v23, %v626_v24 }
 0x389   : > { %v633_v27 = vpack.c.bf16 %v632_v26, %v631_v25 }
 0x38b   : > { %2235 = vmatmul.mubr.msk.bf16.vlgmr.msra.gmra.mrb[8].mxu1 %vm592_vm9, %v633_v27 }
 0x45e   : > { %v692_v29 = vpop.f32.mrb[8].mxu1 }
 0x45f   : > { %v693_v30 = vadd.f32 %v2055_v28, %v692_v29  ;;  %v2236_v31 = vpop.f32.mrb[9].mxu1 }
 0x460   : > { %v695_v32 = vpop.f32.mrb[10].mxu1 }
 0x461   : > { %v696_v33 = vadd.f32 %v2055_v28, %v695_v32  ;;  %v2237_v34 = vpop.f32.mrb[11].mxu1  ;;  %v699_v35 = vmul.f32 0.35355338, %v693_v30 }
 0x463   : > { %2242 = vmatprep.mubr.msk.f32.mxu1 %vm714_vm10, %v699_v35  ;;  %v2757_v36 = vpack.i.bf16 %v696_v33, %v693_v30  ;;  %v700_v37 = vmul.f32 0.35355338, %v696_v33 }
 0x465   : > { %2422 = vrot.lane.b32.xlu0 %v2757_v36, %s2560_s21  ;;  %2417 = vrot.lane.b32.xlu1 %v2757_v36, %s2558_s28  ;;  %s2569_s28 = smov 40  }
 0x469   : > { %800 = vrot.lane.b32.xlu0 %v699_v35, %s2561_s22  ;;  %2427 = vrot.lane.b32.xlu1 %v2757_v36, %s2562_s23 }
 0x46d   : > { %982 = vrot.lane.b32.xlu0 %v699_v35, %s2563_s26  ;;  %2432 = vrot.lane.b32.xlu1 %v2757_v36, %s2564_s30 }
 0x471   : > { %891 = vrot.lane.b32.xlu0 %v699_v35, %s2565_s8  ;;  %802 = vrot.lane.b32.xlu1 %v700_v37, %s2561_s22 }
 0x475   : > { %984 = vrot.lane.b32.xlu1 %v700_v37, %s2563_s26 }
 0x479   : > { %893 = vrot.lane.b32.xlu1 %v700_v37, %s2565_s8 }
 0x4d7   : > { %v2423_v38 = vpop.permute.xlu0 %2422  ;;  %v2418_v39 = vpop.permute.xlu1 %2417 }
 0x4d8   : > { %v2425_v40 = vunpack.i.h.bf16 %v2423_v38  ;;  %v2424_v41 = vunpack.i.l.bf16 %v2423_v38  ;;  %v2420_v42 = vunpack.i.h.bf16 %v2418_v39  ;;  %v2419_v43 = vunpack.i.l.bf16 %v2418_v39 }
 0x4da   : > { %v2338_v45 = vpack.c.bf16 %v2420_v42, %v2419_v43  ;;  %v2344_v49 = vpack.c.bf16 %v2425_v40, %v2424_v41 }
 0x4db   : > { %v801_v46 = vpop.permute.xlu0 %800  ;;  %v2428_v47 = vpop.permute.xlu1 %2427 }
 0x4dc   : > { %v2430_v50 = vunpack.i.h.bf16 %v2428_v47  ;;  %v2429_v51 = vunpack.i.l.bf16 %v2428_v47  ;;  %2340 = vmatprep.subr.msk.bf16.mxu1 %vm2766_vm11, %v2338_v45 }
 0x4dd   : > { %2343 = vmatpush3.bf16.xpose.msk.msra.mxu1 %vm2766_vm11, %v2338_v45 }
 0x4de   : > { %v2356_v52 = vpack.c.bf16 %v2430_v50, %v2429_v51  ;;  %2346 = vmatprep.subr.msk.bf16.mxu1 %vm2766_vm11, %v2344_v49 }
 0x4df   : > { %v983_v53 = vpop.permute.xlu0 %982  ;;  %v2433_v54 = vpop.permute.xlu1 %2432 }
 0x4e0   : > { %v2435_v55 = vunpack.i.h.bf16 %v2433_v54  ;;  %v2434_v56 = vunpack.i.l.bf16 %v2433_v54  ;;  %2358 = vmatprep.subr.msk.bf16.mxu0 %vm2766_vm11, %v2356_v52  ;;  %2263 = vmatprep.mubr.msk.f32.mxu0 %vm714_vm10, %v983_v53 }
 0x4e1   : > { %2361 = vmatpush3.bf16.xpose.msk.msra.mxu0 %vm2766_vm11, %v2356_v52 }
 0x4e2   : > { %v2350_v59 = vpack.c.bf16 %v2435_v55, %v2434_v56 }
 0x4e3   : > { %v803_v57 = vpop.permute.xlu1 %802  ;;  %v892_v61 = vpop.permute.xlu0 %891 }
 0x4e4   : > { %2243 = vmatmul.mubr.msk.f32.vlgmr.msra.gmra.mrb[12].mxu1 %vm714_vm10, %v700_v37 }
 0x4e5   : > { %2349 = vmatpush3.bf16.xpose.msk.msra.mxu1 %vm2766_vm11, %v2344_v49  ;;  %2249 = vmatprep.mubr.msk.f32.mxu1 %vm714_vm10, %v801_v46 }
 0x4e6   : > { %2352 = vmatprep.subr.msk.bf16.mxu1 %vm2766_vm11, %v2350_v59 }
 0x4e7   : > { %v985_v60 = vpop.permute.xlu1 %984 }
 0x4e8   : > { %2264 = vmatmul.mubr.msk.f32.vlgmr.msra.gmra.mrb[4].mxu0 %vm714_vm10, %v985_v60 }
 0x4eb   : > { %v894_v62 = vpop.permute.xlu1 %893 }
 0x4ec   : > { %2250 = vmatmul.mubr.msk.f32.vlgmr.msra.gmra.mrb[14].mxu1 %vm714_vm10, %v803_v57 }
 0x4ed   : > { %2355 = vmatpush3.bf16.xpose.msk.msra.mxu1 %vm2766_vm11, %v2350_v59  ;;  %2256 = vmatprep.mubr.msk.f32.mxu1 %vm714_vm10, %v892_v61 }
 0x4f4   : > { %2257 = vmatmul.mubr.msk.f32.vlgmr.msra.gmra.mrb[16].mxu1 %vm714_vm10, %v894_v62 }
 0x5b7   : > { %v2244_v5 = vpop.f32.mrb[12].mxu1 }
 0x5b8   : > { %v797_v6 = vadd.f32 %v2244_v5, %v707_v3  ;;  %v791_v7 = vpop.f32.mrb[13].mxu1 }
 0x5b9   : > { %v792_v8 = vadd.f32 %v791_v7, %v706_v4 }
 0x5bb   : > { %v2265_v9 = vpop.f32.mrb[4].mxu0  ;;  %v1090_v10 = vsel %vm1089_vm14, %v792_v8, -inf }
 0x5bc   : > { %v1070_v11 = vadd.f32 %v2265_v9, %v707_v3  ;;  %v1064_v12 = vpop.f32.mrb[5].mxu0  ;;  %1091 = vmax.xlane.f32.xlu0 %v1090_v10 }
 0x5bd   : > { %v1065_v19 = vadd.f32 %v1064_v12, %v706_v4 }
 0x5be   : > { %v1083_v13 = vrot.slane %v1070_v11, 4 }
 0x5bf   : > { %v1082_v14 = vrot.slane %v1065_v19, 4  ;;  %v2251_v15 = vpop.f32.mrb[14].mxu1 }
 0x5c0   : > { %v888_v16 = vadd.f32 %v2251_v15, %v707_v3  ;;  %v882_v21 = vpop.f32.mrb[15].mxu1 }
 0x5c1   : > { %v883_v17 = vadd.f32 %v882_v21, %v706_v4  ;;  %v1084_v18 = vsel %vm584_vm8, %v1082_v14, %v1083_v13 }
 0x5c2   : > { %v1076_v20 = vrot.slane %v888_v16, 4  ;;  %v1105_v31 = vsel %vm1089_vm14, %v1084_v18, -inf }
 0x5c3   : > { %v1075_v22 = vrot.slane %v883_v17, 4 }
 0x5c5   : > { %v1077_v23 = vsel %vm584_vm8, %v1075_v22, %v1076_v20  ;;  %v1087_v24 = vsel %vm584_vm8, %v797_v6, %v1075_v22 }
 0x5c6   : > { %v1096_v25 = vsel %vm1089_vm14, %v1077_v23, -inf  ;;  %v1093_v26 = vsel %vm1089_vm14, %v1087_v24, -inf }
 0x5c7   : > { %v2258_v27 = vpop.f32.mrb[16].mxu1  ;;  %1097 = vmax.xlane.f32.xlu1 %v1096_v25  ;;  %1094 = vmax.xlane.f32.xlu0 %v1093_v26 }
 0x5c8   : > { %v979_v28 = vadd.f32 %v2258_v27, %v707_v3  ;;  %v973_v29 = vpop.f32.mrb[17].mxu1 }
 0x5c9   : > { %v974_v30 = vadd.f32 %v973_v29, %v706_v4 }
 0x5ca   : > { %v1088_v32 = vsel %vm584_vm8, %v979_v28, %v1082_v14 }
 0x5cb   : > { %1106 = vmax.xlane.f32.xlu1 %v1105_v31  ;;  %v1102_v33 = vsel %vm1089_vm14, %v1088_v32, -inf  ;;  %v1099_v34 = vsel %vm1089_vm14, %v974_v30, -inf }
 0x5cc   : > { %1103 = vmax.xlane.f32.xlu0 %v1102_v33 }
 0x5d0   : > { %1100 = vmax.xlane.f32.xlu0 %v1099_v34 }
 0x5dc   : > { %2437 = vrot.lane.b32.xlu1 %v2757_v36, %s2557_s27  ;;  %s2568_s27 = smov 48  }
 0x649   : > { %v1092_v35 = vpop.xlane.xlu0 %1091 }
 0x64a   : > { %v1108_v37 = vsub.f32 %v792_v8, %v1092_v35 }
 0x64c   : > { %v1114_v38 = vmul.f32 1.442695, %v1108_v37 }
 0x64e   : > { %2509 = vpow2.f32 %v1114_v38 }
 0x654   : > { %v1098_v39 = vpop.xlane.xlu1 %1097  ;;  %v1095_v40 = vpop.xlane.xlu0 %1094 }
 0x655   : > { %v1110_v41 = vsub.f32 %v1077_v23, %v1098_v39  ;;  %v1109_v43 = vsub.f32 %v1087_v24, %v1095_v40 }
 0x657   : > { %v1118_v42 = vmul.f32 1.442695, %v1110_v41  ;;  %v1116_v51 = vmul.f32 1.442695, %v1109_v43 }
 0x658   : > { %v2510_v44 = vpop.eup %2509  ;;  %v1107_v45 = vpop.xlane.xlu1 %1106 }
 0x659   : > { %2511 = vpow2.f32 %v1118_v42  ;;  %v1113_v46 = vsub.f32 %v1084_v18, %v1107_v45  ;;  %v1104_v47 = vpop.xlane.xlu0 %1103  ;;  %v1126_v49 = vsel %vm1089_vm14, %v2510_v44, 0.0 }
 0x65a   : > { %v1112_v50 = vsub.f32 %v1088_v32, %v1104_v47  ;;  %1127 = vadd.xlane.f32.xlu1 %v1126_v49 }
 0x65b   : > { %v1124_v52 = vmul.f32 1.442695, %v1113_v46  ;;  %v2489_v46 = vld [vmem:[%s2971_s4] sm:$0xff]  }
 0x65c   : > { %v1122_v53 = vmul.f32 1.442695, %v1112_v50  ;;  %v2438_v54 = vpop.permute.xlu1 %2437 }
 0x65d   : > { %2513 = vpow2.f32 %v1124_v52  ;;  %v2440_v55 = vunpack.i.h.bf16 %v2438_v54  ;;  %v2439_v56 = vunpack.i.l.bf16 %v2438_v54  ;;  %v1101_v57 = vpop.xlane.xlu0 %1100 }
 0x65e   : > { %2515 = vpow2.f32 %v1122_v53  ;;  %v1111_v59 = vsub.f32 %v974_v30, %v1101_v57 }
 0x65f   : > { %2517 = vpow2.f32 %v1116_v51  ;;  %v2362_v61 = vpack.c.bf16 %v2440_v55, %v2439_v56 }
 0x660   : > { %v1120_v62 = vmul.f32 1.442695, %v1111_v59  ;;  %v2490_v59 = vld [vmem:[%s2971_s4 + $0x8] sm:$0xff]  }
 0x661   : > { %2364 = vmatprep.subr.msk.bf16.mxu0 %vm2810_vm1, %v2362_v61 }
 0x662   : > { %2519 = vpow2.f32 %v1120_v62  ;;  %2367 = vmatpush3.bf16.msk.msra.mxu0 %vm2810_vm1, %v2362_v61 }
 0x663   : > { %v2512_v63 = vpop.eup %2511 }
 0x664   : > { %v1132_v0 = vsel %vm1089_vm14, %v2512_v63, 0.0 }
 0x665   : > { %1133 = vadd.xlane.f32.xlu0 %v1132_v0 }
 0x667   : > { %v2514_v2 = vpop.eup %2513 }
 0x668   : > { %v2516_v3 = vpop.eup %2515  ;;  %v1141_v4 = vsel %vm1089_vm14, %v2514_v2, 0.0 }
 0x669   : > { %v2518_v5 = vpop.eup %2517  ;;  %1142 = vadd.xlane.f32.xlu1 %v1141_v4  ;;  %v1138_v6 = vsel %vm1089_vm14, %v2516_v3, 0.0 }
 0x66a   : > { %1139 = vadd.xlane.f32.xlu0 %v1138_v6  ;;  %v1129_v8 = vsel %vm1089_vm14, %v2518_v5, 0.0 }
 0x66c   : > { %v2520_v7 = vpop.eup %2519 }
 0x66d   : > { %1130 = vadd.xlane.f32.xlu1 %v1129_v8  ;;  %v1135_v9 = vsel %vm1089_vm14, %v2520_v7, 0.0 }
 0x66e   : > { %1136 = vadd.xlane.f32.xlu0 %v1135_v9 }
 0x67e   : > { %2447 = vrot.lane.b32.xlu1 %v2757_v36, %s2568_s27 }
 0x682   : > { %2452 = vrot.lane.b32.xlu1 %v2757_v36, %s2569_s28 }
 0x684   : > { %2442 = vrot.lane.b32.xlu0 %v2757_v36, %s2570_s9 }
 0x688   : > { %1559 = vrot.lane.b32.xlu0 %v2489_v46, %s2559_s29 }
 0x6e7   : > { %v1128_v10 = vpop.xlane.xlu1 %1127 }
 0x6e8   : > { %2521 = vrcp.f32 %v1128_v10 }
 0x6f2   : > { %v2522_v11 = vpop.eup %2521  ;;  %v1134_v12 = vpop.xlane.xlu0 %1133 }
 0x6f3   : > { %v1150_v19 = vmul.f32 %v2522_v11, %v2510_v44  ;;  %2523 = vrcp.f32 %v1134_v12 }
 0x6f5   : > { %2270 = vmatprep.mubr.msk.f32.mxu0 %vm1089_vm14, %v1150_v19 }
 0x6f6   : > { %v1143_v13 = vpop.xlane.xlu1 %1142 }
 0x6f7   : > { %2525 = vrcp.f32 %v1143_v13  ;;  %v1140_v14 = vpop.xlane.xlu0 %1139 }
 0x6f8   : > { %2527 = vrcp.f32 %v1140_v14 }
 0x6fa   : > { %v1131_v15 = vpop.xlane.xlu1 %1130 }
 0x6fb   : > { %2529 = vrcp.f32 %v1131_v15  ;;  %v1137_v16 = vpop.xlane.xlu0 %1136 }
 0x6fc   : > { %2531 = vrcp.f32 %v1137_v16  ;;  %v2090_v16 = vld [vmem:[%s2969_s2 + $0x5] ss:$0 sm:$0xff] }
 0x6fd   : > { %v2524_v20 = vpop.eup %2523 }
 0x6fe   : > { %v2448_v21 = vpop.permute.xlu1 %2447  ;;  %v1152_v32 = vmul.f32 %v2524_v20, %v2512_v63 }
 0x6ff   : > { %v2450_v17 = vunpack.i.h.bf16 %v2448_v21  ;;  %v2449_v18 = vunpack.i.l.bf16 %v2448_v21  ;;  %v2443_v36 = vpop.permute.xlu0 %2442 }
 0x700   : > { %v2445_v22 = vunpack.i.h.bf16 %v2443_v36  ;;  %v2444_v23 = vunpack.i.l.bf16 %v2443_v36  ;;  %v1246_v41 = vrot.slane %v1152_v32, 4 }
 0x701   : > { %v2526_v24 = vpop.eup %2525  ;;  %v2374_v25 = vpack.c.bf16 %v2450_v17, %v2449_v18 }
 0x702   : > { %v2528_v26 = vpop.eup %2527  ;;  %v2368_v27 = vpack.c.bf16 %v2445_v22, %v2444_v23  ;;  %v2453_v28 = vpop.permute.xlu1 %2452  ;;  %v1155_v33 = vmul.f32 %v2526_v24, %v2514_v2 }
 0x703   : > { %v2455_v29 = vunpack.i.h.bf16 %v2453_v28  ;;  %v2454_v30 = vunpack.i.l.bf16 %v2453_v28  ;;  %2376 = vmatprep.subr.msk.bf16.mxu0 %vm2810_vm1, %v2374_v25  ;;  %v1154_v31 = vmul.f32 %v2528_v26, %v2516_v3  ;;  %v1560_v47 = vpop.permute.xlu0 %1559 }
 0x704   : > { %2370 = vmatprep.subr.msk.bf16.mxu1 %vm2810_vm1, %v2368_v27  ;;  %v1424_v43 = vrot.slane %v1155_v33, 4 }
 0x705   : > { %v2530_v34 = vpop.eup %2529  ;;  %v2380_v35 = vpack.c.bf16 %v2455_v29, %v2454_v30  ;;  %2373 = vmatpush3.bf16.msk.msra.mxu1 %vm2810_vm1, %v2368_v27  ;;  %v1423_v42 = vrot.slane %v1154_v31, 4 }
 0x706   : > { %v2532_v37 = vpop.eup %2531  ;;  %v1151_v38 = vmul.f32 %v2530_v34, %v2518_v5  ;;  %v2491_v34 = vld [vmem:[%s2972_s5] sm:$0xff]  }
 0x707   : > { %2382 = vmatprep.subr.msk.bf16.mxu1 %vm2810_vm1, %v2380_v35  ;;  %v1153_v39 = vmul.f32 %v2532_v37, %v2520_v7  ;;  %v1425_v45 = vsel %vm584_vm8, %v1423_v42, %v1424_v43 }
 0x708   : > { %2271 = vmatmul.mubr.msk.f32.vlgmr.msra.gmra.mrb[6].mxu0 %vm1089_vm14, %v1151_v38  ;;  %v1245_v40 = vrot.slane %v1151_v38, 4 }
 0x709   : > { %2379 = vmatpush3.bf16.msk.msra.mxu0 %vm2810_vm1, %v2374_v25  ;;  %2284 = vmatprep.mubr.msk.f32.mxu0 %vm1089_vm14, %v1153_v39 }
 0x70a   : > { %v1247_v44 = vsel %vm584_vm8, %v1245_v40, %v1246_v41  ;;  %2294 = vmatprep.subr.bf16.mxu0 %v2553_v1 }
 0x70b   : > { %2277 = vmatprep.mubr.msk.f32.mxu1 %vm1089_vm14, %v1247_v44  ;;  %v2091_v44 = vld [vmem:[%s2969_s2 + $0x6] ss:$0 sm:$0xff] }
 0x70c   : > { %2278 = vmatmul.mubr.msk.f32.vlgmr.msra.gmra.mrb[18].mxu1 %vm1089_vm14, %v1246_v41  ;;  %2285 = vmatmul.mubr.msk.f32.vlgmr.msra.gmra.mrb[8].mxu0 %vm1089_vm14, %v1154_v31 }
 0x70d   : > { %2385 = vmatpush3.bf16.msk.msra.mxu1 %vm2810_vm1, %v2380_v35  ;;  %2291 = vmatprep.mubr.msk.f32.mxu1 %vm1089_vm14, %v1425_v45  ;;  %v2492_v35 = vld [vmem:[%s2972_s5 + $0x8] sm:$0xff]  }
 0x70e   : > { %2298 = vmatprep.mubr.msk.bf16.mxu0 %vm2554_vm0, %v2553_v1  ;;  %2302 = vmatprep.subr.bf16.mxu1 %v2553_v1 }
 0x70f   : > { %2295 = vmatpush3.bf16.msra.mxu0 %v1560_v47 }
 0x710   : > { %2292 = vmatmul.mubr.msk.f32.vlgmr.msra.gmra.mrb[20].mxu1 %vm1089_vm14, %v1424_v43  ;;  %2296 = vmatprep.subr.bf16.mxu0 %v2553_v1 }
 0x711   : > { %2306 = vmatprep.mubr.msk.bf16.mxu1 %vm2554_vm0, %v2553_v1  ;;  %2303 = vmatpush3.bf16.msra.mxu1 %v2491_v34 }
 0x712   : > { %2304 = vmatprep.subr.bf16.mxu1 %v2553_v1 }
 0x715   : > { %2305 = vmatpush3.bf16.msra.mxu1 %v2492_v35 }
 0x716   : > { %2330 = vmatprep.subr.bf16.mxu1 %v2553_v1 }
 0x7db   : > { %v2272_v49 = vpop.f32.mrb[6].mxu0 }
 0x7dc   : > { %v1235_v50 = vpop.f32.mrb[7].mxu0 }
 0x7df   : > { %v2279_v51 = vpop.f32.mrb[18].mxu1  ;;  %v2286_v52 = vpop.f32.mrb[8].mxu0 }
 0x7e0   : > { %v1325_v53 = vpop.f32.mrb[19].mxu1  ;;  %v1413_v54 = vpop.f32.mrb[9].mxu0 }
 0x7e1   : > { %v2456_v55 = vpack.i.bf16 %v2279_v51, %v1325_v53  ;;  %v2461_v56 = vpack.i.bf16 %v2286_v52, %v1413_v54 }
 0x7e3   : > { %2462 = vrot.lane.b32.xlu0 %v2461_v56, %s2571_s12  ;;  %2457 = vrot.lane.b32.xlu1 %v2456_v55, %s2572_s13  ;;  %v2293_v57 = vpop.f32.mrb[20].mxu1  ;;  %v2493_v55 = vld [vmem:[%s2973_s6 + $0x40] sm:$0xff]   ;;  %v2494_v56 = vld [vmem:[%s2973_s6 + $0x48] sm:$0xff]   ;;  %s2113_s13 = sshll.u32 %s2980_s25, 4 }
 0x7e4   : > { %v1503_v60 = vpop.f32.mrb[21].mxu1 }
 0x7e5   : > { %v2466_v61 = vpack.i.bf16 %v2293_v57, %v1503_v60  ;;  %v2495_v57 = vld [vmem:[%s2973_s6 + $0x50] sm:$0xff]   ;;  %v2497_v60 = vld [vmem:[%s2973_s6 + $0x60] sm:$0xff]  }
 0x7e7   : > { %2467 = vrot.lane.b32.xlu1 %v2466_v61, %s2573_s16  ;;  %1561 = vrot.lane.b32.xlu0 %v2490_v59, %s2559_s29  ;;  %v2496_v59 = vld [vmem:[%s2973_s6 + $0x58] sm:$0xff]   ;;  %v2498_v61 = vld [vmem:[%s2973_s6 + $0x68] sm:$0xff]   ;;  %s289_s16 = scalar_lea.vmem %s2974_s7, %s2113_s13 }
 0x855   : > { %v2463_v62 = vpop.permute.xlu0 %2462  ;;  %v2458_v63 = vpop.permute.xlu1 %2457 }
 0x856   : > { %v2460_v0 = vunpack.i.h.bf16 %v2458_v63  ;;  %v2459_v2 = vunpack.i.l.bf16 %v2458_v63  ;;  %v2465_v3 = vunpack.i.h.bf16 %v2463_v62  ;;  %v2464_v4 = vunpack.i.l.bf16 %v2463_v62  ;;  %v2499_v62 = vld [vmem:[%s2973_s6 + $0x70] sm:$0xff]   ;;  %v2500_v63 = vld [vmem:[%s2973_s6 + $0x78] sm:$0xff]  }
 0x858   : > { %v1537_v5 = vsel %vm714_vm10, %v2272_v49, %v2460_v0  ;;  %v1536_v6 = vsel %vm714_vm10, %v1235_v50, %v2459_v2  ;;  %v2092_v50 = vld [vmem:[%s2969_s2 + $0x7] ss:$0 sm:$0xff]  ;;  %v2093_v0 = vld [vmem:[%s2969_s2 + $0x8] ss:$0 sm:$0xff] }
 0x859   : > { %v2468_v7 = vpop.permute.xlu1 %2467  ;;  %v1562_v8 = vpop.permute.xlu0 %1561  ;;  %v1539_v11 = vsel %vm1538_vm2, %v1536_v6, %v2464_v4  ;;  %v1540_v12 = vsel %vm1538_vm2, %v1537_v5, %v2465_v3 }
 0x85a   : > { %v2470_v9 = vunpack.i.h.bf16 %v2468_v7  ;;  %v2469_v10 = vunpack.i.l.bf16 %v2468_v7  ;;  %2297 = vmatpush3.bf16.msra.mxu0 %v1562_v8 }
 0x85b   : > { %2310 = vmatprep.subr.bf16.mxu0 %v2553_v1 }
 0x85c   : > { %v1543_v19 = vsel %vm1541_vm3, %v1540_v12, %v2470_v9  ;;  %v1542_v13 = vsel %vm1541_vm3, %v1539_v11, %v2469_v10 }
 0x85d   : > { %v1544_v14 = vpack.c.bf16 %v1543_v19, %v1542_v13 }
 0x85f   : > { %2299 = vmatmul.mubr.msk.bf16.vlgmr.msra.gmra.mrb[12].mxu0 %vm592_vm9, %v1544_v14 }
 0x860   : > { %2326 = vmatprep.mubr.msk.bf16.mxu0 %vm2554_vm0, %v2553_v1  ;;  %2311 = vmatpush3.bf16.msra.mxu0 %v2493_v55 }
 0x861   : > { %2312 = vmatprep.subr.bf16.mxu0 %v2553_v1 }
 0x864   : > { %2313 = vmatpush3.bf16.msra.mxu0 %v2494_v56  ;;  %v2106_v56 = vld [vmem:[%s2969_s2 + $0xa] ss:$0 sm:$0xff] }
 0x865   : > { %2314 = vmatprep.subr.bf16.mxu0 %v2553_v1 }
 0x868   : > { %2315 = vmatpush3.bf16.msra.mxu0 %v2495_v57 }
 0x869   : > { %2316 = vmatprep.subr.bf16.mxu0 %v2553_v1 }
 0x86c   : > { %2317 = vmatpush3.bf16.msra.mxu0 %v2496_v59 }
 0x86d   : > { %2318 = vmatprep.subr.bf16.mxu0 %v2553_v1 }
 0x870   : > { %2319 = vmatpush3.bf16.msra.mxu0 %v2497_v60 }
 0x871   : > { %2320 = vmatprep.subr.bf16.mxu0 %v2553_v1 }
 0x874   : > { %2321 = vmatpush3.bf16.msra.mxu0 %v2498_v61 }
 0x875   : > { %2322 = vmatprep.subr.bf16.mxu0 %v2553_v1 }
 0x878   : > { %2323 = vmatpush3.bf16.msra.mxu0 %v2499_v62 }
 0x879   : > { %2324 = vmatprep.subr.bf16.mxu0 %v2553_v1 }
 0x87c   : > { %2325 = vmatpush3.bf16.msra.mxu0 %v2500_v63 }
 0x932   : > { %v1602_v15 = vpop.f32.mrb[12].mxu0 }
 0x933   : > { %v1609_v21 = vadd.f32 %v1602_v15, %v2731_v58  ;;  %v2300_v17 = vpop.f32.mrb[13].mxu0 }
 0x934   : > { %v1605_v18 = vpop.f32.mrb[14].mxu0 }
 0x935   : > { %v2873_v36 = vadd.f32 %v2090_v16, %v1609_v21  ;;  %v1610_v20 = vadd.f32 %v1605_v18, %v2723_v48  ;;  %v2301_v22 = vpop.f32.mrb[15].mxu0 }
 0x937   : > { %v2876_v23 = vadd.f32 %v2090_v16, %v1610_v20  ;;  %v1620_v24 = vsel %vm592_vm9, %v2873_v36, 0.0 }
 0x938   : > { %1621 = vadd.xlane.f32.xlu1 %v1620_v24 }
 0x939   : > { %v1623_v25 = vsel %vm596_vm4, %v2876_v23, 0.0 }
 0x93a   : > { %1624 = vadd.xlane.f32.xlu0 %v1623_v25 }
 0x9c5   : > { %v1622_v26 = vpop.xlane.xlu1 %1621 }
 0x9c6   : > { %v1626_v27 = vmul.f32 0.03125, %v1622_v26 }
 0x9c7   : > { %v1625_v58 = vpop.xlane.xlu0 %1624 }
 0x9c8   : > { %v1628_v28 = vsub.f32 %v2873_v36, %v1626_v27  ;;  %v1627_v29 = vmul.f32 0.03125, %v1625_v58 }
 0x9ca   : > { %v1629_v30 = vsub.f32 %v2876_v23, %v1627_v29  ;;  %v1630_v48 = vmul.f32 %v1628_v28, %v1628_v28 }
 0x9cc   : > { %v1632_v31 = vsel %vm592_vm9, %v1630_v48, 0.0  ;;  %v1631_v32 = vmul.f32 %v1629_v30, %v1629_v30 }
 0x9cd   : > { %1633 = vadd.xlane.f32.xlu0 %v1632_v31 }
 0x9ce   : > { %v1635_v33 = vsel %vm596_vm4, %v1631_v32, 0.0 }
 0x9cf   : > { %1636 = vadd.xlane.f32.xlu1 %v1635_v33 }
 0xa5a   : > { %v1634_v37 = vpop.xlane.xlu0 %1633 }
 0xa5b   : > { %v1638_v38 = vmul.f32 0.03125, %v1634_v37 }
 0xa5c   : > { %v1637_v39 = vpop.xlane.xlu1 %1636 }
 0xa5d   : > { %v1640_v40 = vadd.f32 1e-05, %v1638_v38  ;;  %v1639_v41 = vmul.f32 0.03125, %v1637_v39 }
 0xa5f   : > { %2533 = vrsqrt.f32 %v1640_v40  ;;  %v1641_v42 = vadd.f32 1e-05, %v1639_v41 }
 0xa61   : > { %2535 = vrsqrt.f32 %v1641_v42 }
 0xa69   : > { %v2534_v43 = vpop.eup %2533 }
 0xa6a   : > { %v1644_v45 = vmul.f32 %v2534_v43, %v1628_v28  ;;  %v2105_v28 = vld [vmem:[%s2969_s2 + $0x9] ss:$0 sm:$0xff] }
 0xa6b   : > { %v2536_v46 = vpop.eup %2535 }
 0xa6c   : > { %v1650_v47 = vmul.f32 %v2091_v44, %v1644_v45  ;;  %v1645_v49 = vmul.f32 %v2536_v46, %v1629_v30  ;;  %v2501_v46 = vld [vmem:[%s2972_s5 + $0x10] sm:$0xff]  }
 0xa6e   : > { %v1651_v51 = vmul.f32 %v2091_v44, %v1645_v49  ;;  %v1656_v52 = vadd.f32 %v2092_v50, %v1650_v47  ;;  %v2502_v47 = vld [vmem:[%s2972_s5 + $0x18] sm:$0xff]  }
 0xa70   : > { %v1657_v53 = vadd.f32 %v2092_v50, %v1651_v51 }
 0xa72   : > { %v1658_v54 = vpack.c.bf16 %v1657_v53, %v1656_v52 }
 0xa74   : > { %2307 = vmatmul.mubr.msk.bf16.vlgmr.msra.gmra.mrb[24].mxu1 %vm592_vm9, %v1658_v54 }
 0xa75   : > { %2334 = vmatprep.mubr.msk.bf16.mxu1 %vm2554_vm0, %v2553_v1  ;;  %2331 = vmatpush3.bf16.msra.mxu1 %v2501_v46 }
 0xa76   : > { %2332 = vmatprep.subr.bf16.mxu1 %v2553_v1  ;;  %v2107_v1 = vld [vmem:[%s2969_s2 + $0xb] ss:$0 sm:$0xff] }
 0xa79   : > { %2333 = vmatpush3.bf16.msra.mxu1 %v2502_v47 }
 0xb47   : > { %v1717_v2 = vpop.f32.mrb[24].mxu1 }
 0xb48   : > { %v1718_v3 = vadd.f32 %v2093_v0, %v1717_v2  ;;  %v2308_v4 = vpop.f32.mrb[25].mxu1 }
 0xb49   : > { %v1720_v5 = vpop.f32.mrb[26].mxu1 }
 0xb4a   : > { %v1724_v6 = vmul.f32 %v1718_v3, %v1718_v3  ;;  %v1721_v7 = vadd.f32 %v2093_v0, %v1720_v5  ;;  %v2309_v8 = vpop.f32.mrb[27].mxu1 }
 0xb4c   : > { %v1726_v9 = vmul.f32 %v1724_v6, %v1718_v3  ;;  %v1725_v10 = vmul.f32 %v1721_v7, %v1721_v7 }
 0xb4e   : > { %v1728_v11 = vmul.f32 0.044715, %v1726_v9  ;;  %v1727_v12 = vmul.f32 %v1725_v10, %v1721_v7 }
 0xb50   : > { %v1730_v19 = vadd.f32 %v1728_v11, %v1718_v3  ;;  %v1729_v13 = vmul.f32 0.044715, %v1727_v12 }
 0xb52   : > { %v1732_v14 = vmul.f32 0.7978846, %v1730_v19  ;;  %v1731_v15 = vadd.f32 %v1729_v13, %v1721_v7 }
 0xb54   : > { %2537 = vtanh.f32 %v1732_v14  ;;  %v1733_v16 = vmul.f32 0.7978846, %v1731_v15 }
 0xb56   : > { %2539 = vtanh.f32 %v1733_v16 }
 0xb5e   : > { %v2538_v21 = vpop.eup %2537 }
 0xb5f   : > { %v1736_v17 = vadd.f32 1.0, %v2538_v21 }
 0xb60   : > { %v2540_v18 = vpop.eup %2539 }
 0xb61   : > { %v1738_v20 = vmul.f32 0.5, %v1736_v17  ;;  %v1737_v22 = vadd.f32 1.0, %v2540_v18 }
 0xb63   : > { %v1739_v24 = vmul.f32 0.5, %v1737_v22  ;;  %v1740_v25 = vmul.f32 %v1738_v20, %v1718_v3 }
 0xb65   : > { %v1741_v26 = vmul.f32 %v1739_v24, %v1721_v7 }
 0xb67   : > { %v1742_v27 = vpack.c.bf16 %v1741_v26, %v1740_v25 }
 0xb69   : > { %2327 = vmatmul.mubr.bf16.vlgmr.msra.gmra.mrb[16].mxu0 %v1742_v27 }
 0xc3c   : > { %v1841_v58 = vpop.f32.mrb[16].mxu0 }
 0xc3d   : > { %v1848_v29 = vadd.f32 %v1841_v58, %v2873_v36  ;;  %v2328_v30 = vpop.f32.mrb[17].mxu0 }
 0xc3e   : > { %v1844_v48 = vpop.f32.mrb[18].mxu0 }
 0xc3f   : > { %v1849_v31 = vadd.f32 %v1844_v48, %v2876_v23  ;;  %v2329_v32 = vpop.f32.mrb[19].mxu0  ;;  %v1855_v33 = vadd.f32 %v2105_v28, %v1848_v29 }
 0xc41   : > { %v1859_v34 = vsel %vm592_vm9, %v1855_v33, 0.0  ;;  %v1856_v35 = vadd.f32 %v2105_v28, %v1849_v31 }
 0xc42   : > { %1860 = vadd.xlane.f32.xlu0 %v1859_v34 }
 0xc43   : > { %v1862_v37 = vsel %vm596_vm4, %v1856_v35, 0.0 }
 0xc44   : > { %1863 = vadd.xlane.f32.xlu1 %v1862_v37 }
 0xccf   : > { %v1861_v38 = vpop.xlane.xlu0 %1860 }
 0xcd0   : > { %v1865_v39 = vmul.f32 0.03125, %v1861_v38 }
 0xcd1   : > { %v1864_v40 = vpop.xlane.xlu1 %1863 }
 0xcd2   : > { %v1867_v41 = vsub.f32 %v1855_v33, %v1865_v39  ;;  %v1866_v42 = vmul.f32 0.03125, %v1864_v40 }
 0xcd4   : > { %v1868_v43 = vsub.f32 %v1856_v35, %v1866_v42  ;;  %v1869_v36 = vmul.f32 %v1867_v41, %v1867_v41 }
 0xcd6   : > { %v1871_v44 = vsel %vm592_vm9, %v1869_v36, 0.0  ;;  %v1870_v45 = vmul.f32 %v1868_v43, %v1868_v43 }
 0xcd7   : > { %1872 = vadd.xlane.f32.xlu0 %v1871_v44 }
 0xcd8   : > { %v1874_v23 = vsel %vm596_vm4, %v1870_v45, 0.0 }
 0xcd9   : > { %1875 = vadd.xlane.f32.xlu1 %v1874_v23 }
 0xd64   : > { %v1873_v49 = vpop.xlane.xlu0 %1872 }
 0xd65   : > { %v1877_v50 = vmul.f32 0.03125, %v1873_v49 }
 0xd66   : > { %v1876_v51 = vpop.xlane.xlu1 %1875 }
 0xd67   : > { %v1879_v52 = vadd.f32 1e-05, %v1877_v50  ;;  %v1878_v53 = vmul.f32 0.03125, %v1876_v51 }
 0xd69   : > { %2541 = vrsqrt.f32 %v1879_v52  ;;  %v1880_v54 = vadd.f32 1e-05, %v1878_v53 }
 0xd6b   : > { %2543 = vrsqrt.f32 %v1880_v54 }
 0xd73   : > { %v2542_v55 = vpop.eup %2541 }
 0xd74   : > { %v1883_v57 = vmul.f32 %v2542_v55, %v1867_v41 }
 0xd75   : > { %v2544_v59 = vpop.eup %2543 }
 0xd76   : > { %v1889_v60 = vmul.f32 %v2106_v56, %v1883_v57  ;;  %v1884_v61 = vmul.f32 %v2544_v59, %v1868_v43 }
 0xd78   : > { %v1890_v62 = vmul.f32 %v2106_v56, %v1884_v61  ;;  %v1895_v63 = vadd.f32 %v2107_v1, %v1889_v60 }
 0xd7a   : > { %v1896_v0 = vadd.f32 %v2107_v1, %v1890_v62 }
 0xd7c   : > { %v1897_v2 = vpack.c.bf16 %v1896_v0, %v1895_v63 }
 0xd7e   : > { %2335 = vmatmul.mubr.msk.bf16.vlgmr.msra.gmra.mrb[28].mxu1 %vm592_vm9, %v1897_v2 }
 0xe51   : > { %v1951_v3 = vpop.f32.mrb[28].mxu1 }
 0xe52   : > { %1958 = vst [vmem:[%s289_s16] sm:$0xff] %v1951_v3  ;;  %v2336_v4 = vpop.f32.mrb[29].mxu1 }
 0xe53   : > { %v1954_v5 = vpop.f32.mrb[30].mxu1 }
 0xe54   : > { %1959 = vst [vmem:[%s289_s16 + $0x8] sm:$0xf] %v1954_v5  ;;  %v2337_v6 = vpop.f32.mrb[31].mxu1 }
 0xe55 PF: > { %s17_s24 = sadd.s32 1, %s2551_s24  }
 0xe56   : > { %p14_p4 = scmp.ge.s32.totalorder %s17_s24, 4  }
 0xe58   :  { %16 = sbr.rel (!%p14_p4) target bundleno = 1 (0x1), region = 81 }

</bundles_post_ra>
